<compile_context>
chip_gen: v5e
topology: v5e:2x2
jax: 0.10.0
libtpu: 0.0.40
codegen_flags: <defaults>
</compile_context>

<pallas_src>
import inspect

import jax
import jax.numpy as jnp
from jax.experimental import pallas as pl
from jax.experimental.pallas import tpu as pltpu

LN_EPS = 1e-5
LEAKY_SLOPE = 0.01

_TARGET_GRID_STEPS = 8            # >= 4 steps per TensorCore on dual-TC v7x
_MAX_BATCH_TILE = 1024            # per-step overhead is amortized well before this
_VMEM_HEADROOM = 2 * 1024 * 1024  # internal scratch / layout slack

_HAS_PIPELINE_MODE = (
    hasattr(pl, "Buffered")
    and "pipeline_mode" in inspect.signature(pl.BlockSpec.__init__).parameters
)


def _round_up(a, m):
    return ((a + m - 1) // m) * m


def _round_down(a, m):
    return (a // m) * m


def _sublane_multiple(dtype):
    # Sub-32-bit dtypes pack along sublanes: 8 rows (f32), 16 (bf16), 32 (int8).
    return max(8, 32 // dtype.itemsize)


def _vmem_capacity_bytes():
    try:
        return int(pltpu.get_tpu_info().vmem_capacity_bytes)
    except Exception:
        return 64 * 1024 * 1024  # conservative fallback (v7x per-TC VMEM)


def encoder_kernel(x_ref, w_ref, b_ref, o_ref):
    # ---- LayerNorm (no affine), statistics in f32, biased variance ----
    xf = x_ref[...].astype(jnp.float32)
    mean = jnp.mean(xf, axis=-1, keepdims=True)
    xc = xf - mean                                   # hoisted; reused below
    var = jnp.mean(xc * xc, axis=-1, keepdims=True)
    xn = xc * jax.lax.rsqrt(var + LN_EPS)

    # ---- Linear: operands in the weight dtype (bf16 native on MXU), f32 accum ----
    y = jnp.dot(xn.astype(w_ref.dtype), w_ref[...],
                preferred_element_type=jnp.float32)
    y = y + b_ref[...].astype(jnp.float32)

    # ---- LeakyReLU (negative_slope = 0.01) ----
    o_ref[...] = jnp.where(y > 0, y, LEAKY_SLOPE * y).astype(o_ref.dtype)


def _build_call(B, inp, hid_p, tb, tn, out_dtype, single_buffer_params,
                vmem_limit_bytes, cost):
    nb = pl.cdiv(B, tb)
    nn = pl.cdiv(hid_p, tn)

    def param_spec(shape):
        # W / b live at a constant (nn == 1) or slowly-varying block index.
        # Single-buffer them when fully resident so the pipeliner does not
        # reserve 2x their VMEM footprint.
        if single_buffer_params:
            return pl.BlockSpec(shape, lambda i, j: (0, j),
                                pipeline_mode=pl.Buffered(buffer_count=1))
        return pl.BlockSpec(shape, lambda i, j: (0, j))

    compiler_kwargs = dict(dimension_semantics=("parallel", "parallel"))
    if vmem_limit_bytes is not None:
        compiler_kwargs["vmem_limit_bytes"] = vmem_limit_bytes

    return pl.pallas_call(
        encoder_kernel,
        out_shape=jax.ShapeDtypeStruct((B, hid_p), out_dtype),
        grid_spec=pltpu.PrefetchScalarGridSpec(
            num_scalar_prefetch=0,
            grid=(nb, nn),
            in_specs=[
                pl.BlockSpec((tb, inp), lambda i, j: (i, 0)),  # tiled x
                param_spec((inp, tn)),                          # W
                param_spec((1, tn)),                            # b
            ],
            out_specs=pl.BlockSpec((tb, tn), lambda i, j: (i, j)),
        ),
        compiler_params=pltpu.CompilerParams(**compiler_kwargs),
        cost_estimate=cost,
    )


def encoder_forward(x, w_t, b, *, block_b=None, weights_in_bf16=None):
    """Fused LayerNorm(no-affine) -> Linear -> LeakyReLU.

    x:   (B, inp)
    w_t: (inp, hidenc)  -- pre-transposed nn.Linear weight
    b:   (hidenc,) or (1, hidenc)
    """
    B, inp = x.shape
    hidenc = w_t.shape[1]
    b = jnp.reshape(b, (1, hidenc))

    # Optional bf16 weights: halves resident-W VMEM + one-time DMA and runs at
    # native bf16 MXU rate. Auto-enabled only once W is MB-scale (LN-normalized
    # activations make the precision loss acceptable); accumulation stays f32.
    if weights_in_bf16 is None:
        weights_in_bf16 = (w_t.dtype == jnp.float32
                           and w_t.size * w_t.dtype.itemsize > 2 * 1024 * 1024)
    if weights_in_bf16 and w_t.dtype == jnp.float32:
        w_t = w_t.astype(jnp.bfloat16)

    # Keep the output tile lane-dense: pad hidenc up to a multiple of 128
    # (pads only the tiny parameters, never x) and slice the result back.
    hid_p = _round_up(hidenc, 128)
    if hid_p != hidenc:
        w_t = jnp.pad(w_t, ((0, 0), (0, hid_p - hidenc)))
        b = jnp.pad(b, ((0, 0), (0, hid_p - hidenc)))

    x_sz = x.dtype.itemsize
    w_sz = w_t.dtype.itemsize
    b_sz = b.dtype.itemsize

    # Generation-aware VMEM budget (v5e/v6e: 128 MiB, v7x: 64 MiB per TC).
    vmem_cap = _vmem_capacity_bytes()
    budget = vmem_cap // 2

    # N tiling: keep W fully resident if it fits comfortably, otherwise tile
    # hidenc with a second parallel grid axis of (inp, tn) W tiles.
    if inp * hid_p * w_sz <= budget // 3:
        tn = hid_p
    else:
        tn = min(hid_p, max(128, _round_down(
            (budget // 3) // max(1, 2 * inp * w_sz), 128)))
    nn = pl.cdiv(hid_p, tn)
    single_buffer_params = _HAS_PIPELINE_MODE and nn == 1
    w_buffers = 1 if single_buffer_params else 2
    resident = w_buffers * (inp * tn * w_sz + tn * b_sz)

    # Batch tile: multiple of the dtype's sublane pack, small enough that the
    # grid has >= _TARGET_GRID_STEPS steps (so the x / out DMAs pipeline),
    # large enough to amortize per-step overhead, and VMEM-fitting.
    sub = _sublane_multiple(x.dtype)
    per_row = 2 * inp * x_sz + 2 * tn * x_sz         # double-buffered x + out
    tb_vmem = max(sub, _round_down(
        max(sub, (budget - resident - _VMEM_HEADROOM) // per_row), sub))
    tb_steps = _round_up(pl.cdiv(B, _TARGET_GRID_STEPS), sub)
    tb = min(_MAX_BATCH_TILE, tb_vmem, tb_steps, _round_up(B, sub))
    if block_b is not None:
        tb = min(tb, _round_up(block_b, sub))
    tb = max(sub, _round_down(tb, sub))

    # Raise the scoped VMEM limit only when needed, clamped to physical VMEM.
    vmem_needed = resident + tb * per_row + _VMEM_HEADROOM
    vmem_limit = None
    if vmem_needed > 24 * 1024 * 1024:
        vmem_limit = min(int(vmem_needed * 1.25), int(vmem_cap * 0.8))

    cost = pl.CostEstimate(
        flops=2 * B * inp * hid_p + 7 * B * inp + 2 * B * hid_p,
        transcendentals=B,  # one rsqrt per row
        bytes_accessed=(B * inp * x_sz + inp * hid_p * w_sz
                        + hid_p * b_sz + B * hid_p * x_sz),
    )

    call = _build_call(B, inp, hid_p, tb, tn, x.dtype,
                       single_buffer_params, vmem_limit, cost)
    try:
        out = call(x, w_t, b)
    except Exception:
        if not single_buffer_params:
            raise
        # Fallback if this JAX build rejects Buffered(1) resident params.
        out = _build_call(B, inp, hid_p, tb, tn, x.dtype,
                          False, vmem_limit, cost)(x, w_t, b)

    return out[:, :hidenc] if hid_p != hidenc else out


def reference_forward(x, w_t, b):
    mean = jnp.mean(x, axis=-1, keepdims=True)
    var = jnp.mean((x - mean) ** 2, axis=-1, keepdims=True)
    xn = (x - mean) / jnp.sqrt(var + LN_EPS)
    y = xn @ w_t + jnp.reshape(b, (1, -1))
    return jnp.where(y > 0, y, LEAKY_SLOPE * y)


if __name__ == "__main__":
    # Shapes consistent with Encoder(inp, hidenc). B=1000 exercises the
    # ragged-last-tile path (tb=128, grid of 8 batch steps); hidenc=128 is
    # lane-dense without padding.
    batch, inp, hidenc = 1000, 64, 128

    key = jax.random.PRNGKey(0)
    kx, kw, kb = jax.random.split(key, 3)

    x = jax.random.normal(kx, (batch, inp), dtype=jnp.float32)

    # Synthetic nn.Linear(inp, hidenc) params; PyTorch stores weight as
    # (hidenc, inp) -- we keep the transpose (inp, hidenc).
    bound = 1.0 / float(inp) ** 0.5
    w_t = jax.random.uniform(kw, (inp, hidenc), dtype=jnp.float32,
                             minval=-bound, maxval=bound)
    b = jax.random.uniform(kb, (1, hidenc), dtype=jnp.float32,
                           minval=-bound, maxval=bound)

    ref = reference_forward(x, w_t, b)

    # 1) Default path (f32 weights at this tiny W size): tight tolerance.
    out = jax.block_until_ready(encoder_forward(x, w_t, b))
    assert out.shape == (batch, hidenc)
    assert jnp.allclose(out, ref, atol=2e-4, rtol=2e-4)

    # 2) bf16-weight path (what auto-selects for MB-scale W): loose tolerance.
    out_bf16 = jax.block_until_ready(
        encoder_forward(x, w_t, b, weights_in_bf16=True))
    assert jnp.allclose(out_bf16, ref, atol=5e-2, rtol=5e-2)

    # 3) Non-multiple-of-128 hidenc exercises the lane-dense padding path.
    hid_small = 96
    out_small = jax.block_until_ready(
        encoder_forward(x, w_t[:, :hid_small], b[:, :hid_small]))
    ref_small = reference_forward(x, w_t[:, :hid_small], b[:, :hid_small])
    assert out_small.shape == (batch, hid_small)
    assert jnp.allclose(out_small, ref_small, atol=2e-4, rtol=2e-4)

    print("KERNEL_OK")
</pallas_src>

<mosaic_0001>
module attributes {stable_mosaic.version = 11 : i64} {
  func.func @encoder_kernel(%arg0: i32, %arg1: i32, %arg2: memref<128x64xf32, #tpu.memory_space<vmem>>, %arg3: memref<64x128xf32, #tpu.memory_space<vmem>>, %arg4: memref<1x128xf32, #tpu.memory_space<vmem>>, %arg5: memref<128x128xf32, #tpu.memory_space<vmem>>) attributes {dimension_semantics = [#tpu.dimension_semantics<parallel>, #tpu.dimension_semantics<parallel>], iteration_bounds = array<i64: 8, 1>, scalar_prefetch = 0 : i64, scratch_operands = 0 : i64, tpu.core_type = #tpu.core_type<tc>, window_params = [{transform_indices = @transform_0, window_bounds = array<i64: 128, 64>}, {pipeline_mode = #tpu.pipeline_mode<synchronous>, transform_indices = @transform_1, window_bounds = array<i64: 64, 128>}, {pipeline_mode = #tpu.pipeline_mode<synchronous>, transform_indices = @transform_2, window_bounds = array<i64: 1, 128>}, {transform_indices = @transform_3, window_bounds = array<i64: 128, 128>}]} {
    %c0 = arith.constant 0 : index
    %c0_0 = arith.constant 0 : index
    %0 = vector.load %arg2[%c0, %c0_0] : memref<128x64xf32, #tpu.memory_space<vmem>>, vector<128x64xf32>
    %cst = arith.constant dense<0.000000e+00> : vector<128xf32>
    %1 = vector.multi_reduction <add>, %0, %cst [1] : vector<128x64xf32> to vector<128xf32>
    %2 = vector.shape_cast %1 : vector<128xf32> to vector<128x1xf32>
    %cst_1 = arith.constant 6.400000e+01 : f32
    %3 = vector.broadcast %cst_1 : f32 to vector<128x1xf32>
    %4 = arith.divf %2, %3 : vector<128x1xf32>
    %5 = vector.broadcast %4 : vector<128x1xf32> to vector<128x64xf32>
    %6 = arith.subf %0, %5 : vector<128x64xf32>
    %7 = arith.mulf %6, %6 : vector<128x64xf32>
    %cst_2 = arith.constant dense<0.000000e+00> : vector<128xf32>
    %8 = vector.multi_reduction <add>, %7, %cst_2 [1] : vector<128x64xf32> to vector<128xf32>
    %9 = vector.shape_cast %8 : vector<128xf32> to vector<128x1xf32>
    %cst_3 = arith.constant 6.400000e+01 : f32
    %10 = vector.broadcast %cst_3 : f32 to vector<128x1xf32>
    %11 = arith.divf %9, %10 : vector<128x1xf32>
    %cst_4 = arith.constant 9.99999974E-6 : f32
    %12 = vector.broadcast %cst_4 : f32 to vector<128x1xf32>
    %13 = arith.addf %11, %12 : vector<128x1xf32>
    %14 = math.rsqrt %13 : vector<128x1xf32>
    %15 = vector.broadcast %14 : vector<128x1xf32> to vector<128x64xf32>
    %16 = arith.mulf %6, %15 : vector<128x64xf32>
    %c0_5 = arith.constant 0 : index
    %c0_6 = arith.constant 0 : index
    %17 = vector.load %arg3[%c0_5, %c0_6] : memref<64x128xf32, #tpu.memory_space<vmem>>, vector<64x128xf32>
    %cst_7 = arith.constant dense<0.000000e+00> : vector<128x128xf32>
    %18 = tpu.matmul %16, %17, %cst_7 {dimension_numbers = #tpu.dot_dimension_numbers<[1], [0], [0], [1], [0, 0, 1, 1], [], []>} : vector<128x64xf32>, vector<64x128xf32>, vector<128x128xf32> -> vector<128x128xf32>
    %c0_8 = arith.constant 0 : index
    %c0_9 = arith.constant 0 : index
    %19 = vector.load %arg4[%c0_8, %c0_9] : memref<1x128xf32, #tpu.memory_space<vmem>>, vector<1x128xf32>
    %20 = vector.broadcast %19 : vector<1x128xf32> to vector<128x128xf32>
    %21 = arith.addf %18, %20 : vector<128x128xf32>
    %cst_10 = arith.constant 0.000000e+00 : f32
    %22 = vector.broadcast %cst_10 : f32 to vector<128x128xf32>
    %23 = arith.cmpf ogt, %21, %22 : vector<128x128xf32>
    %cst_11 = arith.constant 0.00999999977 : f32
    %24 = vector.broadcast %cst_11 : f32 to vector<128x128xf32>
    %25 = arith.mulf %24, %21 : vector<128x128xf32>
    %26 = arith.select %23, %21, %25 : vector<128x128xi1>, vector<128x128xf32>
    %c0_12 = arith.constant 0 : index
    %c0_13 = arith.constant 0 : index
    %27 = vector.load %arg5[%c0_12, %c0_13] : memref<128x128xf32, #tpu.memory_space<vmem>>, vector<128x128xf32>
    tpu.vector_store %arg5[%c0_12, %c0_13], %26 {strides = array<i32>} : memref<128x128xf32, #tpu.memory_space<vmem>>, vector<128x128xf32>,
    return
  }
  func.func @transform_0(%arg0: i32, %arg1: i32) -> (i32, i32) {
    %c0_i32 = arith.constant 0 : i32
    %c0_i32_0 = arith.constant 0 : i32
    return %arg0, %c0_i32 : i32, i32
  }
  func.func @transform_1(%arg0: i32, %arg1: i32) -> (i32, i32) {
    %c0_i32 = arith.constant 0 : i32
    %c0_i32_0 = arith.constant 0 : i32
    return %c0_i32, %arg1 : i32, i32
  }
  func.func @transform_2(%arg0: i32, %arg1: i32) -> (i32, i32) {
    %c0_i32 = arith.constant 0 : i32
    %c0_i32_0 = arith.constant 0 : i32
    return %c0_i32, %arg1 : i32, i32
  }
  func.func @transform_3(%arg0: i32, %arg1: i32) -> (i32, i32) {
    %c0_i32 = arith.constant 0 : i32
    return %arg0, %arg1 : i32, i32
  }
}

module attributes {stable_mosaic.version = 11 : i64} {
  func.func @encoder_kernel(%arg0: i32, %arg1: i32, %arg2: memref<128x64xf32, #tpu.memory_space<vmem>>, %arg3: memref<64x128xf32, #tpu.memory_space<vmem>>, %arg4: memref<1x128xf32, #tpu.memory_space<vmem>>, %arg5: memref<128x128xf32, #tpu.memory_space<vmem>>) attributes {dimension_semantics = [#tpu.dimension_semantics<parallel>, #tpu.dimension_semantics<parallel>], iteration_bounds = array<i64: 8, 1>, scalar_prefetch = 0 : i64, scratch_operands = 0 : i64, tpu.core_type = #tpu.core_type<tc>, window_params = [{transform_indices = @transform_0, window_bounds = array<i64: 128, 64>}, {transform_indices = @transform_1, window_bounds = array<i64: 64, 128>}, {transform_indices = @transform_2, window_bounds = array<i64: 1, 128>}, {transform_indices = @transform_3, window_bounds = array<i64: 128, 128>}]} {
    %c0 = arith.constant 0 : index
    %c0_0 = arith.constant 0 : index
    %0 = vector.load %arg2[%c0, %c0_0] : memref<128x64xf32, #tpu.memory_space<vmem>>, vector<128x64xf32>
    %cst = arith.constant dense<0.000000e+00> : vector<128xf32>
    %1 = vector.multi_reduction <add>, %0, %cst [1] : vector<128x64xf32> to vector<128xf32>
    %2 = vector.shape_cast %1 : vector<128xf32> to vector<128x1xf32>
    %cst_1 = arith.constant 6.400000e+01 : f32
    %3 = vector.broadcast %cst_1 : f32 to vector<128x1xf32>
    %4 = arith.divf %2, %3 : vector<128x1xf32>
    %5 = vector.broadcast %4 : vector<128x1xf32> to vector<128x64xf32>
    %6 = arith.subf %0, %5 : vector<128x64xf32>
    %7 = arith.mulf %6, %6 : vector<128x64xf32>
    %cst_2 = arith.constant dense<0.000000e+00> : vector<128xf32>
    %8 = vector.multi_reduction <add>, %7, %cst_2 [1] : vector<128x64xf32> to vector<128xf32>
    %9 = vector.shape_cast %8 : vector<128xf32> to vector<128x1xf32>
    %cst_3 = arith.constant 6.400000e+01 : f32
    %10 = vector.broadcast %cst_3 : f32 to vector<128x1xf32>
    %11 = arith.divf %9, %10 : vector<128x1xf32>
    %cst_4 = arith.constant 9.99999974E-6 : f32
    %12 = vector.broadcast %cst_4 : f32 to vector<128x1xf32>
    %13 = arith.addf %11, %12 : vector<128x1xf32>
    %14 = math.rsqrt %13 : vector<128x1xf32>
    %15 = vector.broadcast %14 : vector<128x1xf32> to vector<128x64xf32>
    %16 = arith.mulf %6, %15 : vector<128x64xf32>
    %c0_5 = arith.constant 0 : index
    %c0_6 = arith.constant 0 : index
    %17 = vector.load %arg3[%c0_5, %c0_6] : memref<64x128xf32, #tpu.memory_space<vmem>>, vector<64x128xf32>
    %cst_7 = arith.constant dense<0.000000e+00> : vector<128x128xf32>
    %18 = tpu.matmul %16, %17, %cst_7 {dimension_numbers = #tpu.dot_dimension_numbers<[1], [0], [0], [1], [0, 0, 1, 1], [], []>} : vector<128x64xf32>, vector<64x128xf32>, vector<128x128xf32> -> vector<128x128xf32>
    %c0_8 = arith.constant 0 : index
    %c0_9 = arith.constant 0 : index
    %19 = vector.load %arg4[%c0_8, %c0_9] : memref<1x128xf32, #tpu.memory_space<vmem>>, vector<1x128xf32>
    %20 = vector.broadcast %19 : vector<1x128xf32> to vector<128x128xf32>
    %21 = arith.addf %18, %20 : vector<128x128xf32>
    %cst_10 = arith.constant 0.000000e+00 : f32
    %22 = vector.broadcast %cst_10 : f32 to vector<128x128xf32>
    %23 = arith.cmpf ogt, %21, %22 : vector<128x128xf32>
    %cst_11 = arith.constant 0.00999999977 : f32
    %24 = vector.broadcast %cst_11 : f32 to vector<128x128xf32>
    %25 = arith.mulf %24, %21 : vector<128x128xf32>
    %26 = arith.select %23, %21, %25 : vector<128x128xi1>, vector<128x128xf32>
    %c0_12 = arith.constant 0 : index
    %c0_13 = arith.constant 0 : index
    %27 = vector.load %arg5[%c0_12, %c0_13] : memref<128x128xf32, #tpu.memory_space<vmem>>, vector<128x128xf32>
    tpu.vector_store %arg5[%c0_12, %c0_13], %26 {strides = array<i32>} : memref<128x128xf32, #tpu.memory_space<vmem>>, vector<128x128xf32>,
    return
  }
  func.func @transform_0(%arg0: i32, %arg1: i32) -> (i32, i32) {
    %c0_i32 = arith.constant 0 : i32
    %c0_i32_0 = arith.constant 0 : i32
    return %arg0, %c0_i32 : i32, i32
  }
  func.func @transform_1(%arg0: i32, %arg1: i32) -> (i32, i32) {
    %c0_i32 = arith.constant 0 : i32
    %c0_i32_0 = arith.constant 0 : i32
    return %c0_i32, %arg1 : i32, i32
  }
  func.func @transform_2(%arg0: i32, %arg1: i32) -> (i32, i32) {
    %c0_i32 = arith.constant 0 : i32
    %c0_i32_0 = arith.constant 0 : i32
    return %c0_i32, %arg1 : i32, i32
  }
  func.func @transform_3(%arg0: i32, %arg1: i32) -> (i32, i32) {
    %c0_i32 = arith.constant 0 : i32
    return %arg0, %arg1 : i32, i32
  }
}

</mosaic_0001>

<bundles_post_ra>
// kernel: tpu_custom_call.1
= control target key start
LH: loop header
LB: loop body
LE: loop exit
PB: predicated region body
PF: predicated region fallthrough
CT: control target
= control target key end

     0   :  { %8 = vsyncpa [#allocation3], 0  ;;  %s1916_s0 = inlined_call_operand.vmem [shape: f32[1000,64], index: 0, kind: input, shape index: {}]   ;;  %s1917_s1 = inlined_call_operand.vmem [shape: f32[64,128], index: 1, kind: input, shape index: {}]   ;;  %s1918_s2 = inlined_call_operand.vmem [shape: f32[1,128], index: 2, kind: input, shape index: {}]   ;;  %s1919_s3 = inlined_call_operand.hbm [shape: f32[1000,128], index: 3, kind: output, shape index: {}]  }
   0x1   :  { %10 = vsyncpa [#allocation3 + $0x1], 0  ;;  %s1196_s12 = smov 0   ;;  %s1198_s13 = smov 0  }
   0x2   :  { %s1200_s14 = smov 0   ;;  %s1202_s15 = smov 0  }
   0x3   :  { %s1204_s16 = smov 0   ;;  %s1206_s17 = smov 0  }
   0x4 LB: > { %s929_s18 = sadd.s32 4294967295, %s1170_s17   ;;  %s930_s19 = sadd.s32 4294967294, %s1170_s17   ;;  %s1170_s17 = sphi %s1206_s17, %s16_s17   ;;  %s1166_s16 = sphi %s1204_s16, %s1947_s16   ;;  %s1162_s15 = sphi %s1202_s15, %s1946_s15   ;;  %s1158_s14 = sphi %s1200_s14, %s1945_s14   ;;  %s1154_s13 = sphi %s1198_s13, %s1944_s13   ;;  %s1150_s12 = sphi %s1196_s12, %s1943_s12  }
   0x5   : > { %s28_s20 = sadd.s32 1, %s1166_s16  ;;  %s115_s21 = sadd.s32 1, %s1158_s14 }
   0x6   : > { %p30_p0 = scmp.ge.s32.totalorder %s28_s20, 8  ;;  %p125_p1 = scmp.ne.s32.totalorder %s1158_s14, %s1154_s13 }
   0x7   : > { %p126_p2 = scmp.eq.s32.totalorder %s929_s18, 7  ;;  %p131_p3 = scmp.ne.s32.totalorder %s1154_s13, %s1150_s12 }
   0x8   : > { %s1949_s20 = smov (%p30_p0, %s28_s20), 0  ;;  %p132_p5 = scmp.eq.s32.totalorder %s930_s19, 7 }
   0x9   : > { %p1236_p4 = por %p126_p2, %p125_p1  ;;  %s110_s23 = ssub.s32 %s1166_s16, %s1949_s20 }
   0xa   : > { %p935_p6 = scmp.ge.s32.totalorder %s1170_s17, 1  ;;  %p113_p7 = scmp.eq.s32.totalorder %s110_s23, 0 }
   0xb   : > { %p1243_p8 = por %p132_p5, %p131_p3  ;;  %p180_p9 = scmp.lt.s32.totalorder %s1170_s17, 9 }
   0xc   : > { %s1249_s25 = scalar_select %p113_p7, %s1158_s14, %s115_s21  }
   0xd   : > { %p181_p10 = pnand %p935_p6, %p180_p9 }
   0xe   : > { %s1252_s26 = sshll.u32 (!%p181_p10), %s1162_s15, 4  ;;  %s212_s5 = sand.u32 (!%p181_p10), 1, %s1154_s13  }
   0xf   : > { %184 = sbr.rel (%p181_p10) target bundleno = 498 (0x1f2), region = 32  ;;  %p220_p11 = scmp.lt.s32.totalorder (!%p181_p10), %s1252_s26, 124 }
  0x10   : > { %s936_s8 = sshll.u32 (!%p181_p10), %s212_s5, 7  ;;  %s1850_s10 = scalar_lea.sflag (!%p181_p10), [#allocation3], %s212_s5 }
  0x11   : > { %s1815_s9 = scalar_lea.vmem (!%p181_p10), [#allocation2], %s936_s8 }
  0x14   : > { %s221_s27 = scalar_select %p220_p11, %s1252_s26, 124  ;;  %vm257_vm0 = vcmask 523264   ;;  %v1172_v32 = vmov 64.0  }
  0x15   : > { %1047 = vrcp.f32 %v1172_v32  ;;  %s815_s11 = ssub.s32 (%p1236_p4), 125, %s1252_s26 }
  0x16   : > { %s938_s28 = sshll.u32 %s221_s27, 3  ;;  %p816_p12 = scmp.lt.s32.totalorder (%p1236_p4), %s815_s11, 16 }
  0x17   : > { %s1259_s4 = scalar_lea.vmem %s1916_s0, %s938_s28 }
  0x18   : > { %v1262_v0 = vld [vmem:[%s1259_s4 + $0x48] sm:$0xff]  ;;  %v249_v1 = vld [vmem:[%s1259_s4 + $0x40] sm:$0xff]  ;;  %v1286_v12 = vld [vmem:[%s1259_s4 + $0x50] sm:$0xff] }
  0x19   : > { %v241_v2 = vld [vmem:[%s1259_s4] sm:$0xff]  ;;  %v285_v3 = vsel %vm257_vm0, %v1262_v0, 0.0  ;;  %v282_v4 = vsel %vm257_vm0, %v249_v1, 0.0  ;;  %v1271_v6 = vld [vmem:[%s1259_s4 + $0x68] sm:$0xff]  ;;  %v288_v15 = vsel %vm257_vm0, %v1286_v12, 0.0  ;;  %v1301_v18 = vld [vmem:[%s1259_s4 + $0x30] sm:$0xff] }
  0x1a   : > { %v258_v5 = vsel %vm257_vm0, %v241_v2, 0.0  ;;  %286 = vadd.xlane.f32.xlu2 %v285_v3  ;;  %283 = vadd.xlane.f32.xlu0 %v282_v4  ;;  %v1274_v7 = vld [vmem:[%s1259_s4 + $0x60] sm:$0xff]  ;;  %v297_v9 = vsel %vm257_vm0, %v1271_v6, 0.0  ;;  %v1289_v13 = vld [vmem:[%s1259_s4 + $0x8] sm:$0xff]  ;;  %v1304_v19 = vld [vmem:[%s1259_s4 + $0x70] sm:$0xff]  ;;  %v276_v21 = vsel %vm257_vm0, %v1301_v18, 0.0 }
  0x1b   : > { %259 = vadd.xlane.f32.xlu1 %v258_v5  ;;  %v1277_v8 = vld [vmem:[%s1259_s4 + $0x20] sm:$0xff]  ;;  %v294_v10 = vsel %vm257_vm0, %v1274_v7, 0.0  ;;  %v1292_v14 = vld [vmem:[%s1259_s4 + $0x28] sm:$0xff]  ;;  %v261_v16 = vsel %vm257_vm0, %v1289_v13, 0.0  ;;  %v1307_v20 = vld [vmem:[%s1259_s4 + $0x10] sm:$0xff]  ;;  %v300_v22 = vsel %vm257_vm0, %v1304_v19, 0.0  ;;  %v1048_v33 = vpop.eup %1047 }
  0x1c   : > { %v270_v11 = vsel %vm257_vm0, %v1277_v8, 0.0  ;;  %v273_v17 = vsel %vm257_vm0, %v1292_v14, 0.0  ;;  %v264_v23 = vsel %vm257_vm0, %v1307_v20, 0.0  ;;  %v1316_v24 = vld [vmem:[%s1259_s4 + $0x18] sm:$0xff]  ;;  %v307_v34 = vmul.f32 64.0, %v1048_v33 }
  0x1d   : > { %v1319_v25 = vld [vmem:[%s1259_s4 + $0x58] sm:$0xff]  ;;  %v267_v27 = vsel %vm257_vm0, %v1316_v24, 0.0  ;;  %vm311_vm1 = vweird.f32 %v1048_v33 }
  0x1e   : > { %v1322_v26 = vld [vmem:[%s1259_s4 + $0x78] sm:$0xff]  ;;  %v291_v28 = vsel %vm257_vm0, %v1319_v25, 0.0  ;;  %v308_v35 = vsub.f32 1.0, %v307_v34 }
  0x1f   : > { %v303_v29 = vsel %vm257_vm0, %v1322_v26, 0.0  ;;  %v1331_v30 = vld [vmem:[%s1259_s4 + $0x38] sm:$0xff] }
  0x20   : > { %v279_v31 = vsel %vm257_vm0, %v1331_v30, 0.0  ;;  %v309_v36 = vmul.f32 %v1048_v33, %v308_v35 }
  0x22   : > { %298 = vadd.xlane.f32.xlu2 %v297_v9  ;;  %295 = vadd.xlane.f32.xlu0 %v294_v10  ;;  %v310_v37 = vadd.f32 %v1048_v33, %v309_v36 }
  0x23   : > { %271 = vadd.xlane.f32.xlu1 %v270_v11 }
  0x24   : > { %v1335_v38 = vsel %vm311_vm1, %v1048_v33, %v310_v37 }
  0x2a   : > { %289 = vadd.xlane.f32.xlu2 %v288_v15  ;;  %262 = vadd.xlane.f32.xlu0 %v261_v16 }
  0x2b   : > { %274 = vadd.xlane.f32.xlu1 %v273_v17 }
  0x32   : > { %277 = vadd.xlane.f32.xlu2 %v276_v21  ;;  %301 = vadd.xlane.f32.xlu0 %v300_v22 }
  0x33   : > { %265 = vadd.xlane.f32.xlu1 %v264_v23 }
  0x3a   : > { %268 = vadd.xlane.f32.xlu2 %v267_v27  ;;  %292 = vadd.xlane.f32.xlu0 %v291_v28 }
  0x3b   : > { %304 = vadd.xlane.f32.xlu1 %v303_v29 }
  0x42   : > { %280 = vadd.xlane.f32.xlu0 %v279_v31 }
  0x8d   : > { %v287_v39 = vpop.xlane.xlu2 %286  ;;  %v284_v40 = vpop.xlane.xlu0 %283 }
  0x8e   : > { %v321_v41 = vmul.f32 %v1335_v38, %v284_v40  ;;  %v260_v42 = vpop.xlane.xlu1 %259  ;;  %v322_v56 = vmul.f32 %v1335_v38, %v287_v39 }
  0x8f   : > { %v313_v43 = vmul.f32 %v1335_v38, %v260_v42 }
  0x90   : > { %v1339_v44 = vsub.f32 %v249_v1, %v321_v41  ;;  %v1369_v63 = vsub.f32 %v1262_v0, %v322_v56 }
  0x91   : > { %v1341_v45 = vsub.f32 %v241_v2, %v313_v43 }
  0x92   : > { %v353_v46 = vmul.f32 %v1339_v44, %v1339_v44  ;;  %v354_v11 = vmul.f32 %v1369_v63, %v1369_v63 }
  0x93   : > { %v345_v47 = vmul.f32 %v1341_v45, %v1341_v45 }
  0x94   : > { %v385_v48 = vsel %vm257_vm0, %v353_v46, 0.0  ;;  %v388_v21 = vsel %vm257_vm0, %v354_v11, 0.0 }
  0x95   : > { %v299_v49 = vpop.xlane.xlu2 %298  ;;  %v296_v50 = vpop.xlane.xlu0 %295  ;;  %386 = vadd.xlane.f32.xlu1 %v385_v48  ;;  %v361_v51 = vsel %vm257_vm0, %v345_v47, 0.0 }
  0x96   : > { %v326_v52 = vmul.f32 %v1335_v38, %v299_v49  ;;  %v325_v53 = vmul.f32 %v1335_v38, %v296_v50  ;;  %362 = vadd.xlane.f32.xlu0 %v361_v51  ;;  %v272_v54 = vpop.xlane.xlu1 %271 }
  0x97   : > { %v317_v55 = vmul.f32 %v1335_v38, %v272_v54 }
  0x98   : > { %v1354_v57 = vsub.f32 %v1271_v6, %v326_v52  ;;  %v1357_v58 = vsub.f32 %v1274_v7, %v325_v53 }
  0x99   : > { %v1360_v59 = vsub.f32 %v1277_v8, %v317_v55 }
  0x9a   : > { %v357_v60 = vmul.f32 %v1357_v58, %v1357_v58  ;;  %v358_v61 = vmul.f32 %v1354_v57, %v1354_v57 }
  0x9b   : > { %v349_v62 = vmul.f32 %v1360_v59, %v1360_v59 }
  0x9c   : > { %v397_v1 = vsel %vm257_vm0, %v357_v60, 0.0  ;;  %v400_v2 = vsel %vm257_vm0, %v358_v61, 0.0 }
  0x9d   : > { %v290_v3 = vpop.xlane.xlu2 %289  ;;  %398 = vadd.xlane.f32.xlu2 %v397_v1  ;;  %v263_v4 = vpop.xlane.xlu0 %262  ;;  %v373_v5 = vsel %vm257_vm0, %v349_v62, 0.0  ;;  %v624_v62 = vld [vmem:[%s1917_s1 + $0x38] sm:$0xff]  ;;  %v622_v1 = vld [vmem:[%s1917_s1 + $0x28] sm:$0xff] }
  0x9e   : > { %v323_v6 = vmul.f32 %v1335_v38, %v290_v3  ;;  %v314_v7 = vmul.f32 %v1335_v38, %v263_v4  ;;  %401 = vadd.xlane.f32.xlu0 %v400_v2  ;;  %374 = vadd.xlane.f32.xlu1 %v373_v5  ;;  %v275_v8 = vpop.xlane.xlu1 %274  ;;  %v621_v2 = vld [vmem:[%s1917_s1 + $0x20] sm:$0xff]  ;;  %v620_v3 = vld [vmem:[%s1917_s1 + $0x18] sm:$0xff]  ;;  %v619_v4 = vld [vmem:[%s1917_s1 + $0x10] sm:$0xff] }
  0x9f   : > { %v318_v9 = vmul.f32 %v1335_v38, %v275_v8  ;;  %685 = vmatpush.msra.mxu0 %v624_v62  ;;  %966 = vmatpush.msra.mxu2 %v624_v62  ;;  %v618_v5 = vld [vmem:[%s1917_s1 + $0x8] sm:$0xff] }
  0xa0   : > { %v1378_v0 = vsub.f32 %v1286_v12, %v323_v6  ;;  %v1381_v10 = vsub.f32 %v1289_v13, %v314_v7  ;;  %965 = vmatpush.msra.mxu1 %v624_v62  ;;  %967 = vmatpush.msra.mxu3 %v624_v62  ;;  %v617_v6 = vld [vmem:[%s1917_s1] sm:$0xff] }
  0xa1   : > { %v1390_v17 = vsub.f32 %v1292_v14, %v318_v9 }
  0xa2   : > { %v355_v15 = vmul.f32 %v1378_v0, %v1378_v0  ;;  %v346_v16 = vmul.f32 %v1381_v10, %v1381_v10 }
  0xa3   : > { %v350_v29 = vmul.f32 %v1390_v17, %v1390_v17 }
  0xa4   : > { %v391_v12 = vsel %vm257_vm0, %v355_v15, 0.0  ;;  %v364_v22 = vsel %vm257_vm0, %v346_v16, 0.0 }
  0xa5   : > { %v278_v13 = vpop.xlane.xlu2 %277  ;;  %389 = vadd.xlane.f32.xlu2 %v388_v21  ;;  %v302_v23 = vpop.xlane.xlu0 %301  ;;  %v376_v36 = vsel %vm257_vm0, %v350_v29, 0.0 }
  0xa6   : > { %v319_v27 = vmul.f32 %v1335_v38, %v278_v13  ;;  %v327_v28 = vmul.f32 %v1335_v38, %v302_v23  ;;  %392 = vadd.xlane.f32.xlu0 %v391_v12  ;;  %365 = vadd.xlane.f32.xlu1 %v364_v22  ;;  %v266_v14 = vpop.xlane.xlu1 %265 }
  0xa7   : > { %v315_v31 = vmul.f32 %v1335_v38, %v266_v14 }
  0xa8   : > { %v1401_v32 = vsub.f32 %v1301_v18, %v319_v27  ;;  %v1404_v33 = vsub.f32 %v1304_v19, %v327_v28 }
  0xa9   : > { %v1412_v37 = vsub.f32 %v1307_v20, %v315_v31 }
  0xaa   : > { %v351_v34 = vmul.f32 %v1401_v32, %v1401_v32  ;;  %v359_v35 = vmul.f32 %v1404_v33, %v1404_v33 }
  0xab   : > { %v347_v43 = vmul.f32 %v1412_v37, %v1412_v37 }
  0xac   : > { %v379_v39 = vsel %vm257_vm0, %v351_v34, 0.0  ;;  %v403_v40 = vsel %vm257_vm0, %v359_v35, 0.0 }
  0xad   : > { %v269_v18 = vpop.xlane.xlu2 %268  ;;  %v293_v41 = vpop.xlane.xlu0 %292  ;;  %377 = vadd.xlane.f32.xlu2 %v376_v36  ;;  %v367_v51 = vsel %vm257_vm0, %v347_v43, 0.0 }
  0xae   : > { %v316_v19 = vmul.f32 %v1335_v38, %v269_v18  ;;  %v324_v42 = vmul.f32 %v1335_v38, %v293_v41  ;;  %380 = vadd.xlane.f32.xlu0 %v379_v39  ;;  %404 = vadd.xlane.f32.xlu1 %v403_v40  ;;  %v305_v46 = vpop.xlane.xlu1 %304 }
  0xaf   : > { %v328_v20 = vmul.f32 %v1335_v38, %v305_v46 }
  0xb0   : > { %v1422_v47 = vsub.f32 %v1316_v24, %v316_v19  ;;  %v1425_v48 = vsub.f32 %v1319_v25, %v324_v42 }
  0xb1   : > { %v1433_v52 = vsub.f32 %v1322_v26, %v328_v20 }
  0xb2   : > { %v348_v49 = vmul.f32 %v1422_v47, %v1422_v47  ;;  %v356_v50 = vmul.f32 %v1425_v48, %v1425_v48 }
  0xb3   : > { %v360_v55 = vmul.f32 %v1433_v52, %v1433_v52 }
  0xb4   : > { %v370_v53 = vsel %vm257_vm0, %v348_v49, 0.0  ;;  %v394_v54 = vsel %vm257_vm0, %v356_v50, 0.0 }
  0xb5   : > { %v281_v24 = vpop.xlane.xlu0 %280  ;;  %368 = vadd.xlane.f32.xlu2 %v367_v51  ;;  %v406_v60 = vsel %vm257_vm0, %v360_v55, 0.0 }
  0xb6   : > { %v320_v25 = vmul.f32 %v1335_v38, %v281_v24  ;;  %371 = vadd.xlane.f32.xlu0 %v370_v53  ;;  %395 = vadd.xlane.f32.xlu1 %v394_v54 }
  0xb8   : > { %v1441_v56 = vsub.f32 %v1331_v30, %v320_v25  ;;  %v623_v30 = vld [vmem:[%s1917_s1 + $0x30] sm:$0xff] }
  0xb9   : > { %686 = vmatpush.msra.mxu0 %v623_v30  ;;  %969 = vmatpush.msra.mxu2 %v623_v30 }
  0xba   : > { %v352_v26 = vmul.f32 %v1441_v56, %v1441_v56  ;;  %968 = vmatpush.msra.mxu1 %v623_v30  ;;  %970 = vmatpush.msra.mxu3 %v623_v30 }
  0xbb   : > { %687 = vmatpush.msra.mxu0 %v622_v1  ;;  %972 = vmatpush.msra.mxu2 %v622_v1 }
  0xbc   : > { %v382_v61 = vsel %vm257_vm0, %v352_v26, 0.0  ;;  %971 = vmatpush.msra.mxu1 %v622_v1  ;;  %973 = vmatpush.msra.mxu3 %v622_v1 }
  0xbd   : > { %407 = vadd.xlane.f32.xlu2 %v406_v60  ;;  %688 = vmatpush.msra.mxu0 %v621_v2 }
  0xbe   : > { %383 = vadd.xlane.f32.xlu1 %v382_v61  ;;  %975 = vmatpush.msra.mxu2 %v621_v2 }
  0xbf   : > { %974 = vmatpush.msra.mxu1 %v621_v2  ;;  %976 = vmatpush.msra.mxu3 %v621_v2 }
  0xc0   : > { %689 = vmatpush.msra.mxu0 %v620_v3  ;;  %978 = vmatpush.msra.mxu2 %v620_v3 }
  0xc1   : > { %977 = vmatpush.msra.mxu1 %v620_v3  ;;  %979 = vmatpush.msra.mxu3 %v620_v3 }
  0xc2   : > { %690 = vmatpush.msra.mxu0 %v619_v4  ;;  %981 = vmatpush.msra.mxu2 %v619_v4 }
  0xc3   : > { %980 = vmatpush.msra.mxu1 %v619_v4  ;;  %982 = vmatpush.msra.mxu3 %v619_v4 }
  0xc4   : > { %691 = vmatpush.msra.mxu0 %v618_v5  ;;  %984 = vmatpush.msra.mxu2 %v618_v5 }
  0xc5   : > { %983 = vmatpush.msra.mxu1 %v618_v5  ;;  %985 = vmatpush.msra.mxu3 %v618_v5 }
  0xc6   : > { %692 = vmatpush.msra.mxu0 %v617_v6  ;;  %987 = vmatpush.msra.mxu2 %v617_v6 }
  0xc7   : > { %986 = vmatpush.msra.mxu1 %v617_v6  ;;  %988 = vmatpush.msra.mxu3 %v617_v6 }
 0x108   : > { %v387_v7 = vpop.xlane.xlu1 %386 }
 0x109   : > { %v363_v8 = vpop.xlane.xlu0 %362  ;;  %v417_v9 = vmul.f32 %v387_v7, %v1335_v38 }
 0x10a   : > { %v409_v11 = vmul.f32 %v363_v8, %v1335_v38 }
 0x10b   : > { %v1473_v15 = vadd.f32 1e-05, %v417_v9 }
 0x10c   : > { %v425_v16 = vadd.f32 1e-05, %v409_v11 }
 0x10d   : > { %1049 = vrsqrt.f32 %v1473_v15  ;;  %vm527_vm5 = vweird.f32 %v1473_v15 }
 0x10e   : > { %1051 = vrsqrt.f32 %v425_v16  ;;  %vm447_vm2 = vweird.f32 %v425_v16 }
 0x110   : > { %v399_v21 = vpop.xlane.xlu2 %398 }
 0x111   : > { %v421_v12 = vmul.f32 %v399_v21, %v1335_v38  ;;  %v402_v22 = vpop.xlane.xlu0 %401  ;;  %v375_v13 = vpop.xlane.xlu1 %374 }
 0x112   : > { %v422_v23 = vmul.f32 %v402_v22, %v1335_v38  ;;  %v413_v27 = vmul.f32 %v375_v13, %v1335_v38 }
 0x113   : > { %v1479_v28 = vpop.eup %1049  ;;  %v1481_v29 = vadd.f32 1e-05, %v421_v12 }
 0x114   : > { %v1483_v14 = vpop.eup %1051  ;;  %v522_v31 = vmul.f32 %v1479_v28, %v1473_v15  ;;  %v1487_v34 = vadd.f32 1e-05, %v422_v23  ;;  %v1489_v35 = vadd.f32 1e-05, %v413_v27  ;;  %vm528_vm4 = vweird.f32 %v1479_v28 }
 0x115   : > { %v442_v36 = vmul.f32 %v1483_v14, %v425_v16  ;;  %1053 = vrsqrt.f32 %v1481_v29  ;;  %vm448_vm3 = vweird.f32 %v1483_v14  ;;  %vm1541_vm7 = vmor %vm527_vm5, %vm528_vm4  ;;  %vm567_vm8 = vweird.f32 %v1481_v29 }
 0x116   : > { %v523_v39 = vmul.f32 %v1479_v28, %v522_v31  ;;  %1055 = vrsqrt.f32 %v1487_v34  ;;  %vm1533_vm6 = vmor %vm447_vm2, %vm448_vm3  ;;  %vm487_vm9 = vweird.f32 %v1489_v35  ;;  %vm577_vm15 = vweird.f32 %v1487_v34 }
 0x117   : > { %v443_v40 = vmul.f32 %v1483_v14, %v442_v36  ;;  %1057 = vrsqrt.f32 %v1489_v35 }
 0x118   : > { %v390_v18 = vpop.xlane.xlu2 %389  ;;  %v524_v19 = vmul.f32 0.5, %v523_v39 }
 0x119   : > { %v444_v41 = vmul.f32 0.5, %v443_v40  ;;  %v418_v42 = vmul.f32 %v390_v18, %v1335_v38  ;;  %v393_v43 = vpop.xlane.xlu0 %392  ;;  %v366_v46 = vpop.xlane.xlu1 %365 }
 0x11a   : > { %v419_v20 = vmul.f32 %v393_v43, %v1335_v38  ;;  %v410_v49 = vmul.f32 %v366_v46, %v1335_v38  ;;  %v525_v60 = vsub.f32 1.5, %v524_v19 }
 0x11b   : > { %v1500_v50 = vpop.eup %1053  ;;  %v1502_v51 = vadd.f32 1e-05, %v418_v42  ;;  %v445_v54 = vsub.f32 1.5, %v444_v41 }
 0x11c   : > { %v1504_v53 = vpop.eup %1055  ;;  %v562_v24 = vmul.f32 %v1500_v50, %v1481_v29  ;;  %v1508_v25 = vadd.f32 1e-05, %v419_v20  ;;  %v1510_v55 = vadd.f32 1e-05, %v410_v49  ;;  %v526_v7 = vmul.f32 %v1479_v28, %v525_v60 }
 0x11d   : > { %v1512_v26 = vpop.eup %1057  ;;  %1059 = vrsqrt.f32 %v1502_v51  ;;  %v572_v30 = vmul.f32 %v1504_v53, %v1487_v34  ;;  %v446_v3 = vmul.f32 %v1483_v14, %v445_v54  ;;  %vm568_vm10 = vweird.f32 %v1500_v50 }
 0x11e   : > { %v482_v61 = vmul.f32 %v1512_v26, %v1489_v35  ;;  %v563_v62 = vmul.f32 %v1500_v50, %v562_v24  ;;  %1061 = vrsqrt.f32 %v1510_v55  ;;  %v530_v40 = vsel %vm1541_vm7, %v1479_v28, %v526_v7  ;;  %vm1622_vm4 = vmor %vm567_vm8, %vm568_vm10 }
 0x11f   : > { %1063 = vrsqrt.f32 %v1508_v25  ;;  %v573_v22 = vmul.f32 %v1504_v53, %v572_v30  ;;  %v450_v36 = vsel %vm1533_vm6, %v1483_v14, %v446_v3  ;;  %vm488_vm11 = vweird.f32 %v1512_v26 }
 0x120   : > { %v483_v1 = vmul.f32 %v1512_v26, %v482_v61  ;;  %v378_v2 = vpop.xlane.xlu2 %377  ;;  %v564_v12 = vmul.f32 0.5, %v563_v62  ;;  %v601_v46 = vmul.f32 %v450_v36, %v1341_v45  ;;  %v609_v20 = vmul.f32 %v530_v40, %v1339_v44  ;;  %vm1592_vm13 = vmor %vm487_vm9, %vm488_vm11 }
 0x121   : > { %v381_v4 = vpop.xlane.xlu0 %380  ;;  %v414_v5 = vmul.f32 %v378_v2, %v1335_v38  ;;  %v405_v6 = vpop.xlane.xlu1 %404  ;;  %v1567_v42 = vmul.f32 0.5, %v573_v22  ;;  %vm457_vm12 = vweird.f32 %v1510_v55  ;;  %vm578_vm1 = vweird.f32 %v1504_v53 }
 0x122   : > { %v484_v8 = vmul.f32 0.5, %v483_v1  ;;  %v415_v9 = vmul.f32 %v381_v4, %v1335_v38  ;;  %v423_v23 = vmul.f32 %v405_v6, %v1335_v38  ;;  %v565_v19 = vsub.f32 1.5, %v564_v12  ;;  %939 = vmatmul.msk.f32.vlgmr.msra.gmra.mxu0 %vm257_vm0, %v601_v46  ;;  %947 = vmatmul.msk.f32.vlgmr.msra.gmra.mxu2 %vm257_vm0, %v609_v20 }
 0x123   : > { %v1530_v11 = vpop.eup %1059  ;;  %v1538_v13 = vadd.f32 1e-05, %v414_v5  ;;  %v575_v3 = vsub.f32 1.5, %v1567_v42  ;;  %vm537_vm2 = vweird.f32 %v1502_v51  ;;  %vm547_vm5 = vweird.f32 %v1508_v25 }
 0x124   : > { %v485_v15 = vsub.f32 1.5, %v484_v8  ;;  %v532_v31 = vmul.f32 %v1530_v11, %v1502_v51  ;;  %v1547_v16 = vadd.f32 1e-05, %v415_v9  ;;  %v1552_v39 = vpop.eup %1061  ;;  %v1569_v43 = vadd.f32 1e-05, %v423_v23 }
 0x125   : > { %1065 = vrsqrt.f32 %v1538_v13  ;;  %v1560_v18 = vpop.eup %1063  ;;  %v452_v14 = vmul.f32 %v1552_v39, %v1510_v55  ;;  %vm538_vm14 = vweird.f32 %v1530_v11  ;;  %v566_v6 = vmul.f32 %v1500_v50, %v565_v19 }
 0x126   : > { %v533_v41 = vmul.f32 %v1530_v11, %v532_v31  ;;  %1067 = vrsqrt.f32 %v1547_v16  ;;  %v486_v54 = vmul.f32 %v1512_v26, %v485_v15  ;;  %v542_v24 = vmul.f32 %v1560_v18, %v1508_v25 }
 0x127   : > { %v453_v28 = vmul.f32 %v1552_v39, %v452_v14  ;;  %1069 = vrsqrt.f32 %v1569_v43  ;;  %vm458_vm3 = vweird.f32 %v1552_v39  ;;  %vm548_vm6 = vweird.f32 %v1560_v18 }
 0x128   : > { %v369_v49 = vpop.xlane.xlu2 %368  ;;  %v534_v62 = vmul.f32 0.5, %v533_v41  ;;  %v490_v21 = vsel %vm1592_vm13, %v1512_v26, %v486_v54  ;;  %v543_v12 = vmul.f32 %v1560_v18, %v542_v24  ;;  %v570_v40 = vsel %vm1622_vm4, %v1500_v50, %v566_v6  ;;  %vm459_vm8 = vmor %vm457_vm12, %vm458_vm3 }
 0x129   : > { %v372_v45 = vpop.xlane.xlu0 %371  ;;  %v411_v60 = vmul.f32 %v369_v49, %v1335_v38  ;;  %v396_v61 = vpop.xlane.xlu1 %395  ;;  %v454_v30 = vmul.f32 0.5, %v453_v28  ;;  %v605_v29 = vmul.f32 %v490_v21, %v1360_v59  ;;  %vm497_vm7 = vweird.f32 %v1538_v13  ;;  %vm539_vm12 = vmor %vm537_vm2, %vm538_vm14 }
 0x12a   : > { %v412_v44 = vmul.f32 %v372_v45, %v1335_v38  ;;  %v420_v1 = vmul.f32 %v396_v61, %v1335_v38  ;;  %v535_v26 = vsub.f32 1.5, %v534_v62  ;;  %v544_v28 = vmul.f32 0.5, %v543_v12  ;;  %vm1687_vm3 = vmor %vm577_vm15, %vm578_vm1 }
 0x12b   : > { %v1585_v2 = vpop.eup %1065  ;;  %v1597_v5 = vadd.f32 1e-05, %v411_v60  ;;  %v455_v8 = vsub.f32 1.5, %v454_v30  ;;  %vm507_vm9 = vweird.f32 %v1547_v16  ;;  %943 = vmatmul.msk.f32.vlgmr.msra.gmra.mxu1 %vm257_vm0, %v605_v29  ;;  %v613_v59 = vmul.f32 %v570_v40, %v1357_v58  ;;  %vm1711_vm1 = vmor %vm547_vm5, %vm548_vm6 }
 0x12c   : > { %v1601_v7 = vpop.eup %1067  ;;  %v492_v35 = vmul.f32 %v1585_v2, %v1538_v13  ;;  %v1607_v9 = vadd.f32 1e-05, %v412_v44  ;;  %v1628_v15 = vadd.f32 1e-05, %v420_v1  ;;  %vm587_vm10 = vweird.f32 %v1569_v43 }
 0x12d   : > { %v502_v22 = vmul.f32 %v1601_v7, %v1547_v16  ;;  %1071 = vrsqrt.f32 %v1597_v5  ;;  %v1630_v31 = vpop.eup %1069  ;;  %v456_v41 = vmul.f32 %v1552_v39, %v455_v8  ;;  %951 = vmatmul.msk.f32.vlgmr.msra.gmra.mxu3 %vm257_vm0, %v613_v59  ;;  %v536_v61 = vmul.f32 %v1530_v11, %v535_v26 }
 0x12e   : > { %v493_v27 = vmul.f32 %v1585_v2, %v492_v35  ;;  %1073 = vrsqrt.f32 %v1607_v9  ;;  %v582_v19 = vmul.f32 %v1630_v31, %v1569_v43  ;;  %vm498_vm11 = vweird.f32 %v1585_v2 }
 0x12f   : > { %v503_v36 = vmul.f32 %v1601_v7, %v502_v22  ;;  %1075 = vrsqrt.f32 %v1628_v15  ;;  %v460_v24 = vsel %vm459_vm8, %v1552_v39, %v456_v41  ;;  %v545_v39 = vsub.f32 1.5, %v544_v28  ;;  %vm499_vm14 = vmor %vm497_vm7, %vm498_vm11 }
 0x130   : > { %v494_v14 = vmul.f32 0.5, %v493_v27  ;;  %v408_v46 = vpop.xlane.xlu2 %407  ;;  %v583_v49 = vmul.f32 %v1630_v31, %v582_v19  ;;  %v602_v58 = vmul.f32 %v460_v24, %v1381_v10  ;;  %vm508_vm13 = vweird.f32 %v1601_v7 }
 0x131   : > { %v424_v50 = vmul.f32 %v408_v46, %v1335_v38  ;;  %v384_v20 = vpop.xlane.xlu1 %383  ;;  %v504_v55 = vmul.f32 0.5, %v503_v36  ;;  %v540_v22 = vsel %vm539_vm12, %v1530_v11, %v536_v61  ;;  %v576_v27 = vmul.f32 %v1504_v53, %v575_v3  ;;  %vm1728_vm4 = vmor %vm507_vm9, %vm508_vm13 }
 0x132   : > { %v416_v54 = vmul.f32 %v384_v20, %v1335_v38  ;;  %v495_v30 = vsub.f32 1.5, %v494_v14  ;;  %v584_v44 = vmul.f32 0.5, %v583_v49  ;;  %940 = vmatmul.msk.f32.gmra.mxu0 %vm257_vm0, %v602_v58  ;;  %v610_v26 = vmul.f32 %v540_v22, %v1369_v63 }
 0x133   : > { %v1656_v45 = vpop.eup %1071  ;;  %v1659_v60 = vadd.f32 1e-05, %v424_v50  ;;  %v505_v21 = vsub.f32 1.5, %v504_v55  ;;  %vm588_vm15 = vweird.f32 %v1630_v31  ;;  %v546_v11 = vmul.f32 %v1560_v18, %v545_v39 }
 0x134   : > { %v1663_v62 = vpop.eup %1073  ;;  %v462_v38 = vmul.f32 %v1656_v45, %v1597_v5  ;;  %v1667_v1 = vadd.f32 1e-05, %v416_v54  ;;  %v585_v6 = vsub.f32 1.5, %v584_v44  ;;  %v496_v34 = vmul.f32 %v1585_v2, %v495_v30  ;;  %948 = vmatmul.msk.f32.gmra.mxu2 %vm257_vm0, %v610_v26  ;;  %vm1740_vm7 = vmor %vm587_vm10, %vm588_vm15 }
 0x135   : > { %v472_v4 = vmul.f32 %v1663_v62, %v1607_v9  ;;  %1077 = vrsqrt.f32 %v1659_v60  ;;  %v1674_v10 = vpop.eup %1075  ;;  %v580_v13 = vsel %vm1687_vm3, %v1504_v53, %v576_v27  ;;  %vm467_vm2 = vweird.f32 %v1597_v5 }
 0x136   : > { %v463_v8 = vmul.f32 %v1656_v45, %v462_v38  ;;  %1079 = vrsqrt.f32 %v1667_v1  ;;  %v552_v51 = vmul.f32 %v1674_v10, %v1628_v15  ;;  %v500_v3 = vsel %vm499_vm14, %v1585_v2, %v496_v34 }
 0x137   : > { %v473_v12 = vmul.f32 %v1663_v62, %v472_v4  ;;  %v586_v40 = vmul.f32 %v1630_v31, %v585_v6  ;;  %v614_v25 = vmul.f32 %v580_v13, %v1354_v57  ;;  %v606_v19 = vmul.f32 %v500_v3, %v1390_v17 }
 0x138   : > { %v464_v23 = vmul.f32 0.5, %v463_v8  ;;  %v553_v29 = vmul.f32 %v1674_v10, %v552_v51  ;;  %vm477_vm5 = vweird.f32 %v1607_v9  ;;  %vm468_vm6 = vweird.f32 %v1656_v45 }
 0x139   : > { %v474_v36 = vmul.f32 0.5, %v473_v12  ;;  %v506_v2 = vmul.f32 %v1601_v7, %v505_v21  ;;  %vm557_vm8 = vweird.f32 %v1628_v15  ;;  %952 = vmatmul.msk.f32.gmra.mxu3 %vm257_vm0, %v614_v25  ;;  %944 = vmatmul.msk.f32.gmra.mxu1 %vm257_vm0, %v606_v19  ;;  %v550_v59 = vsel %vm1711_vm1, %v1560_v18, %v546_v11  ;;  %vm469_vm10 = vmor %vm467_vm2, %vm468_vm6 }
 0x13a   : > { %v465_v42 = vsub.f32 1.5, %v464_v23  ;;  %v554_v14 = vmul.f32 0.5, %v553_v29  ;;  %v590_v43 = vsel %vm1740_vm7, %v1630_v31, %v586_v40  ;;  %vm478_vm9 = vweird.f32 %v1663_v62 }
 0x13b   : > { %v1078_v41 = vpop.eup %1077  ;;  %v475_v50 = vsub.f32 1.5, %v474_v36  ;;  %vm558_vm11 = vweird.f32 %v1674_v10  ;;  %v611_v55 = vmul.f32 %v550_v59, %v1378_v0  ;;  %v510_v31 = vsel %vm1728_vm4, %v1601_v7, %v506_v2  ;;  %vm1782_vm14 = vmor %vm477_vm5, %vm478_vm9 }
 0x13c   : > { %v1080_v46 = vpop.eup %1079  ;;  %v592_v53 = vmul.f32 %v1078_v41, %v1659_v60  ;;  %v555_v17 = vsub.f32 1.5, %v554_v14  ;;  %v466_v49 = vmul.f32 %v1656_v45, %v465_v42  ;;  %v615_v30 = vmul.f32 %v590_v43, %v1404_v33  ;;  %vm1771_vm12 = vmor %vm557_vm8, %vm558_vm11 }
 0x13d   : > { %v512_v16 = vmul.f32 %v1080_v46, %v1667_v1  ;;  %vm598_vm13 = vweird.f32 %v1078_v41  ;;  %vm517_vm3 = vweird.f32 %v1667_v1  ;;  %949 = vmatmul.msk.f32.gmra.mxu2 %vm257_vm0, %v611_v55  ;;  %v476_v0 = vmul.f32 %v1663_v62, %v475_v50 }
 0x13e   : > { %v593_v20 = vmul.f32 %v1078_v41, %v592_v53  ;;  %v556_v18 = vmul.f32 %v1674_v10, %v555_v17  ;;  %v470_v58 = vsel %vm469_vm10, %v1656_v45, %v466_v49  ;;  %vm518_vm15 = vweird.f32 %v1080_v46 }
 0x13f   : > { %v513_v54 = vmul.f32 %v1080_v46, %v512_v16  ;;  %v603_v5 = vmul.f32 %v470_v58, %v1412_v37  ;;  %v607_v7 = vmul.f32 %v510_v31, %v1401_v32  ;;  %vm597_vm1 = vweird.f32 %v1659_v60  ;;  %vm519_vm4 = vmor %vm517_vm3, %vm518_vm15 }
 0x140   : > { %v594_v24 = vmul.f32 0.5, %v593_v20  ;;  %v560_v15 = vsel %vm1771_vm12, %v1674_v10, %v556_v18  ;;  %vm599_vm2 = vmor %vm597_vm1, %vm598_vm13  ;;  %v480_v32 = vsel %vm1782_vm14, %v1663_v62, %v476_v0 }
 0x141   : > { %v514_v61 = vmul.f32 0.5, %v513_v54  ;;  %941 = vmatmul.msk.f32.gmra.mxu0 %vm257_vm0, %v603_v5  ;;  %953 = vmatmul.msk.f32.gmra.mxu3 %vm257_vm0, %v615_v30  ;;  %v612_v39 = vmul.f32 %v560_v15, %v1425_v48  ;;  %v604_v60 = vmul.f32 %v480_v32, %v1422_v47  ;;  %v1810_v48 = vld [vmem:[%s1918_s2] ss:$0 sm:$0xff] }
 0x142   : > { %v595_v38 = vsub.f32 1.5, %v594_v24  ;;  %945 = vmatmul.msk.f32.gmra.mxu1 %vm257_vm0, %v607_v7 }
 0x143   : > { %v515_v37 = vsub.f32 1.5, %v514_v61 }
 0x144   : > { %v596_v45 = vmul.f32 %v1078_v41, %v595_v38 }
 0x145   : > { %v516_v9 = vmul.f32 %v1080_v46, %v515_v37  ;;  %950 = vmatmul.msk.f32.gmra.mxu2 %vm257_vm0, %v612_v39 }
 0x146   : > { %v600_v4 = vsel %vm599_vm2, %v1078_v41, %v596_v45 }
 0x147   : > { %v520_v10 = vsel %vm519_vm4, %v1080_v46, %v516_v9  ;;  %v616_v8 = vmul.f32 %v600_v4, %v1433_v52 }
 0x148   : > { %v608_v6 = vmul.f32 %v520_v10, %v1441_v56 }
 0x149   : > { %942 = vmatmul.msk.f32.gmra.mxu0 %vm257_vm0, %v604_v60  ;;  %954 = vmatmul.msk.f32.gmra.mxu3 %vm257_vm0, %v616_v8 }
 0x14a   : > { %946 = vmatmul.msk.f32.gmra.mxu1 %vm257_vm0, %v608_v6 }
 0x19f   : > { %v694_v47 = vpop.f32.mrf.mxu0 }
 0x1a0   : > { %v695_v56 = vadd.f32 %v1810_v48, %v694_v47 }
 0x1a2   : > { %vm742_vm5 = vcmp.gt.f32.partialorder %v695_v56, 0.0  ;;  %v758_v52 = vmul.f32 0.01, %v695_v56 }
 0x1a4   : > { %v774_v62 = vsel %vm742_vm5, %v695_v56, %v758_v52 }
 0x1a5   : > { %790 = vst [vmem:[%s1815_s9] sm:$0xff] %v774_v62  ;;  %v718_v1 = vpop.f32.mrf.mxu2 }
 0x1a6   : > { %v719_v35 = vadd.f32 %v1810_v48, %v718_v1 }
 0x1a8   : > { %v706_v21 = vpop.f32.mrf.mxu1  ;;  %vm750_vm0 = vcmp.gt.f32.partialorder %v719_v35, 0.0  ;;  %v766_v51 = vmul.f32 0.01, %v719_v35 }
 0x1a9   : > { %v707_v12 = vadd.f32 %v1810_v48, %v706_v21 }
 0x1aa   : > { %v782_v23 = vsel %vm750_vm0, %v719_v35, %v766_v51 }
 0x1ab   : > { %vm746_vm6 = vcmp.gt.f32.partialorder %v707_v12, 0.0  ;;  %v762_v22 = vmul.f32 0.01, %v707_v12  ;;  %798 = vst [vmem:[%s1815_s9 + $0x40] sm:$0xff] %v782_v23 }
 0x1ad   : > { %v778_v27 = vsel %vm746_vm6, %v707_v12, %v762_v22 }
 0x1ae   : > { %794 = vst [vmem:[%s1815_s9 + $0x20] sm:$0xff] %v778_v27 }
 0x1af   : > { %v697_v26 = vpop.f32.mrf.mxu0 }
 0x1b0   : > { %v698_v34 = vadd.f32 %v1810_v48, %v697_v26  ;;  %v730_v29 = vpop.f32.mrf.mxu3 }
 0x1b1   : > { %v731_v11 = vadd.f32 %v1810_v48, %v730_v29 }
 0x1b2   : > { %vm743_vm7 = vcmp.gt.f32.partialorder %v698_v34, 0.0  ;;  %v759_v36 = vmul.f32 0.01, %v698_v34 }
 0x1b3   : > { %vm754_vm8 = vcmp.gt.f32.partialorder %v731_v11, 0.0  ;;  %v770_v42 = vmul.f32 0.01, %v731_v11 }
 0x1b4   : > { %v775_v63 = vsel %vm743_vm7, %v698_v34, %v759_v36 }
 0x1b5   : > { %791 = vst [vmem:[%s1815_s9 + $0x8] sm:$0xff] %v775_v63  ;;  %v786_v3 = vsel %vm754_vm8, %v731_v11, %v770_v42 }
 0x1b6   : > { %v709_v13 = vpop.f32.mrf.mxu1  ;;  %802 = vst [vmem:[%s1815_s9 + $0x60] sm:$0xff] %v786_v3 }
 0x1b7   : > { %v710_v40 = vadd.f32 %v1810_v48, %v709_v13  ;;  %v721_v41 = vpop.f32.mrf.mxu2 }
 0x1b8   : > { %v722_v25 = vadd.f32 %v1810_v48, %v721_v41 }
 0x1b9   : > { %vm747_vm9 = vcmp.gt.f32.partialorder %v710_v40, 0.0  ;;  %v763_v14 = vmul.f32 0.01, %v710_v40 }
 0x1ba   : > { %vm751_vm10 = vcmp.gt.f32.partialorder %v722_v25, 0.0  ;;  %v767_v46 = vmul.f32 0.01, %v722_v25 }
 0x1bb   : > { %v779_v19 = vsel %vm747_vm9, %v710_v40, %v763_v14 }
 0x1bc   : > { %v733_v28 = vpop.f32.mrf.mxu3  ;;  %795 = vst [vmem:[%s1815_s9 + $0x28] sm:$0xff] %v779_v19  ;;  %v783_v17 = vsel %vm751_vm10, %v722_v25, %v767_v46 }
 0x1bd   : > { %v734_v2 = vadd.f32 %v1810_v48, %v733_v28  ;;  %799 = vst [vmem:[%s1815_s9 + $0x48] sm:$0xff] %v783_v17 }
 0x1be   : > { %v700_v53 = vpop.f32.mrf.mxu0 }
 0x1bf   : > { %v701_v57 = vadd.f32 %v1810_v48, %v700_v53  ;;  %v712_v16 = vpop.f32.mrf.mxu1  ;;  %vm755_vm11 = vcmp.gt.f32.partialorder %v734_v2, 0.0  ;;  %v771_v59 = vmul.f32 0.01, %v734_v2 }
 0x1c0   : > { %v713_v50 = vadd.f32 %v1810_v48, %v712_v16  ;;  %v724_v49 = vpop.f32.mrf.mxu2 }
 0x1c1   : > { %vm744_vm12 = vcmp.gt.f32.partialorder %v701_v57, 0.0  ;;  %v760_v20 = vmul.f32 0.01, %v701_v57  ;;  %v787_v43 = vsel %vm755_vm11, %v734_v2, %v771_v59  ;;  %v725_v18 = vadd.f32 %v1810_v48, %v724_v49 }
 0x1c2   : > { %vm748_vm13 = vcmp.gt.f32.partialorder %v713_v50, 0.0  ;;  %v764_v54 = vmul.f32 0.01, %v713_v50  ;;  %803 = vst [vmem:[%s1815_s9 + $0x68] sm:$0xff] %v787_v43 }
 0x1c3   : > { %v776_v24 = vsel %vm744_vm12, %v701_v57, %v760_v20  ;;  %vm752_vm3 = vcmp.gt.f32.partialorder %v725_v18, 0.0  ;;  %v768_v58 = vmul.f32 0.01, %v725_v18 }
 0x1c4   : > { %792 = vst [vmem:[%s1815_s9 + $0x10] sm:$0xff] %v776_v24  ;;  %v780_v55 = vsel %vm748_vm13, %v713_v50, %v764_v54  ;;  %v736_v31 = vpop.f32.mrf.mxu3 }
 0x1c5   : > { %796 = vst [vmem:[%s1815_s9 + $0x30] sm:$0xff] %v780_v55  ;;  %v737_v30 = vadd.f32 %v1810_v48, %v736_v31  ;;  %v784_v44 = vsel %vm752_vm3, %v725_v18, %v768_v58 }
 0x1c6   : > { %v703_v61 = vpop.f32.mrf.mxu0  ;;  %800 = vst [vmem:[%s1815_s9 + $0x50] sm:$0xff] %v784_v44 }
 0x1c7   : > { %v704_v5 = vadd.f32 %v1810_v48, %v703_v61  ;;  %v715_v38 = vpop.f32.mrf.mxu1  ;;  %vm756_vm14 = vcmp.gt.f32.partialorder %v737_v30, 0.0  ;;  %v772_v0 = vmul.f32 0.01, %v737_v30 }
 0x1c8   : > { %v716_v33 = vadd.f32 %v1810_v48, %v715_v38  ;;  %v727_v15 = vpop.f32.mrf.mxu2 }
 0x1c9   : > { %vm745_vm15 = vcmp.gt.f32.partialorder %v704_v5, 0.0  ;;  %v761_v37 = vmul.f32 0.01, %v704_v5  ;;  %v788_v7 = vsel %vm756_vm14, %v737_v30, %v772_v0  ;;  %v728_v9 = vadd.f32 %v1810_v48, %v727_v15 }
 0x1ca   : > { %vm749_vm1 = vcmp.gt.f32.partialorder %v716_v33, 0.0  ;;  %v765_v45 = vmul.f32 0.01, %v716_v33  ;;  %804 = vst [vmem:[%s1815_s9 + $0x70] sm:$0xff] %v788_v7 }
 0x1cb   : > { %v777_v39 = vsel %vm745_vm15, %v704_v5, %v761_v37  ;;  %vm753_vm2 = vcmp.gt.f32.partialorder %v728_v9, 0.0  ;;  %v769_v4 = vmul.f32 0.01, %v728_v9 }
 0x1cc   : > { %793 = vst [vmem:[%s1815_s9 + $0x18] sm:$0xff] %v777_v39  ;;  %v781_v32 = vsel %vm749_vm1, %v716_v33, %v765_v45  ;;  %v739_v10 = vpop.f32.mrf.mxu3 }
 0x1cd   : > { %797 = vst [vmem:[%s1815_s9 + $0x38] sm:$0xff] %v781_v32  ;;  %v740_v60 = vadd.f32 %v1810_v48, %v739_v10  ;;  %v785_v6 = vsel %vm753_vm2, %v728_v9, %v769_v4 }
 0x1ce   : > { %801 = vst [vmem:[%s1815_s9 + $0x58] sm:$0xff] %v785_v6  ;;  %813 = sbr.rel (!%p1236_p4) target bundleno = 498 (0x1f2), region = 36 }
 0x1cf   : > { %vm757_vm4 = vcmp.gt.f32.partialorder %v740_v60, 0.0  ;;  %v773_v8 = vmul.f32 0.01, %v740_v60 }
 0x1d1   : > { %v789_v47 = vsel %vm757_vm4, %v740_v60, %v773_v8 }
 0x1d2   : > { %805 = vst [vmem:[%s1815_s9 + $0x78] sm:$0xff] %v789_v47 }
 0x1d3   : > { %s1951_s11 = smov (!%p816_p12, %s815_s11), 16 }
 0x1d4   : > { %s957_s18 = sshll.u32 %s1951_s11, 3 }
 0x1d5   : > { %s819_s19 = ssub.s32 128, %s957_s18 }
 0x1d6   : > { %s820_s21 = sshll.u32 %s819_s19, 4 }
 0x1d7   : > { %821 = vsyncadd %s1850_s10, %s820_s21  ;;  %p1859_p13 = scmp.ne.s32.totalorder %s957_s18, 0  ;;  %s964_s22 = sshll.u32 %s1162_s15, 7 }
 0x1d8   : > { %s825_s28 = scalar_lea.hbm %s1919_s3, %s964_s22  ;;  %s827_s29 = sshll.u32 %s1815_s9, 4  ;;  %s1868_s29 = int_to_ptr.vmem [resolvable:$true] %s827_s29 }
 0x1d9   : > { %s829_s30 = sshll.u32 %s825_s28, 4  ;;  %s961_s4 = sshll.u32 %s1951_s11, 7  ;;  %s1870_s30 = int_to_ptr.hbm [resolvable:$true] %s829_s30 }
 0x1da   : > { %s1081_s5 = sshra.s32 %s1868_s29, 4  ;;  %s1083_s6 = sshrl.u32 %s961_s4, 4  ;;  %s1082_s5 = int_to_ptr.vmem [resolvable:$true] %s1081_s5 }
 0x1db   : > { %s1088_s7 = scalar_lea.vmem %s1082_s5, %s1083_s6  ;;  %s1173_s15 = smov [#allocation2]  }
 0x1dc   : > { %p1089_p0 = scmp.ne.s32.totalorder %s1082_s5, %s1088_s7  ;;  %s1092_s8 = scalar_lea.vmem %s1173_s15, 256 }
 0x1dd   : > { %p1094_p3 = scmp.lt.s32.totalorder %s1092_s8, %s1088_s7 }
 0x1de   : > { %p1090_p1 = pnand %p1089_p0, %p1859_p13 }
 0x1e0   : > { %p1091_p2 = pneg %p1090_p1 }
 0x1e2   : > { %p1096_p4 = pnand %p1094_p3, %p1091_p2 }
 0x1e4   : > { %1099 = shalt.err (!%p1096_p4)
}
 0x1e5   : > { %s1100_s9 = sshra.s32 %s1870_s30, 4  ;;  %s1111_s22 = scalar_lea.hbm %s1919_s3, 1000  ;;  %s1101_s9 = int_to_ptr.hbm [resolvable:$true] %s1100_s9 }
 0x1e6   : > { %s1107_s18 = scalar_lea.hbm %s1101_s9, %s1083_s6  ;;  %p1112_p9 = scmp.lt.s32.totalorder %s1101_s9, %s1919_s3 }
 0x1e7   : > { %p1108_p5 = scmp.ne.s32.totalorder %s1101_s9, %s1107_s18  ;;  %p1113_p10 = scmp.lt.s32.totalorder %s1111_s22, %s1107_s18 }
 0x1e9   : > { %p1109_p6 = pnand %p1108_p5, %p1859_p13  ;;  %p1114_p11 = por %p1113_p10, %p1112_p9 }
 0x1eb   : > { %p1110_p7 = pneg %p1109_p6 }
 0x1ed   : > { %p1115_p12 = pnand %p1114_p11, %p1110_p7 }
 0x1ef   : > { %1118 = shalt.err (!%p1115_p12)
}
 0x1f0   : > { %s1174_s28 = smov 128   ;;  %s1175_s5 = smov 8  }
 0x1f1   : > { %835 = dma.vmem_to_hbm [thread:$0]  (%p1859_p13), %s1868_s29, %s961_s4, %s1870_s30, %s1850_s10, %s1174_s28, %s1174_s28, %s1175_s5  }
 0x1f2 PF: > { %p994_p0 = scmp.ge.s32.totalorder %s1170_s17, 2  ;;  %s844_s6 = sand.u32 1, %s1150_s12  }
 0x1f3   : > { %s845_s7 = scalar_lea.sflag [#allocation3], %s844_s6 }
 0x1f4   : > { %p991_p1 = pnand %p994_p0, %p1243_p8 }
 0x1f6   : > { %p992_p2 = pneg %p991_p1 }
 0x1f8   : > { %1145 = dma.done.wait (%p992_p2), %s845_s7, 2048  }
 0x1f9   : > { %1147 = vsyncadd (%p992_p2), %s845_s7, 4294965248  ;;  %s16_s17 = sadd.s32 1, %s1170_s17   ;;  %s1943_s12 = smov %s1154_s13 }
 0x1fa   : > { %p13_p3 = scmp.ge.s32.totalorder %s16_s17, 10   ;;  %s1944_s13 = smov %s1158_s14 }
 0x1fb   : > { %s1945_s14 = smov %s1249_s25  ;;  %s1946_s15 = smov %s1166_s16 }
 0x1fc   : > { %s1947_s16 = smov %s1949_s20  ;;  %15 = sbr.rel (!%p13_p3) target bundleno = 4 (0x4), region = 73 }
 0x201   :  { %851 = vsyncpa [#allocation3], 1 }
 0x202   :  { %853 = vsyncpa [#allocation3 + $0x1], 1 }

// kernel: tpu_custom_call.1
= control target key start
LH: loop header
LB: loop body
LE: loop exit
PB: predicated region body
PF: predicated region fallthrough
CT: control target
= control target key end

     0   :  { %8 = vsyncpa [#allocation3], 0  ;;  %s1916_s0 = inlined_call_operand.vmem [shape: f32[1000,64], index: 0, kind: input, shape index: {}]   ;;  %s1917_s1 = inlined_call_operand.vmem [shape: f32[64,128], index: 1, kind: input, shape index: {}]   ;;  %s1918_s2 = inlined_call_operand.vmem [shape: f32[1,128], index: 2, kind: input, shape index: {}]   ;;  %s1919_s3 = inlined_call_operand.hbm [shape: f32[1000,128], index: 3, kind: output, shape index: {}]  }
   0x1   :  { %10 = vsyncpa [#allocation3 + $0x1], 0  ;;  %s1196_s12 = smov 0   ;;  %s1198_s13 = smov 0  }
   0x2   :  { %s1200_s14 = smov 0   ;;  %s1202_s15 = smov 0  }
   0x3   :  { %s1204_s16 = smov 0   ;;  %s1206_s17 = smov 0  }
   0x4 LB: > { %s929_s18 = sadd.s32 4294967295, %s1170_s17   ;;  %s930_s19 = sadd.s32 4294967294, %s1170_s17   ;;  %s1170_s17 = sphi %s1206_s17, %s16_s17   ;;  %s1166_s16 = sphi %s1204_s16, %s1947_s16   ;;  %s1162_s15 = sphi %s1202_s15, %s1946_s15   ;;  %s1158_s14 = sphi %s1200_s14, %s1945_s14   ;;  %s1154_s13 = sphi %s1198_s13, %s1944_s13   ;;  %s1150_s12 = sphi %s1196_s12, %s1943_s12  }
   0x5   : > { %s28_s20 = sadd.s32 1, %s1166_s16  ;;  %s115_s21 = sadd.s32 1, %s1158_s14 }
   0x6   : > { %p30_p0 = scmp.ge.s32.totalorder %s28_s20, 8  ;;  %p125_p1 = scmp.ne.s32.totalorder %s1158_s14, %s1154_s13 }
   0x7   : > { %p126_p2 = scmp.eq.s32.totalorder %s929_s18, 7  ;;  %p131_p3 = scmp.ne.s32.totalorder %s1154_s13, %s1150_s12 }
   0x8   : > { %s1949_s20 = smov (%p30_p0, %s28_s20), 0  ;;  %p132_p5 = scmp.eq.s32.totalorder %s930_s19, 7 }
   0x9   : > { %p1236_p4 = por %p126_p2, %p125_p1  ;;  %s110_s23 = ssub.s32 %s1166_s16, %s1949_s20 }
   0xa   : > { %p935_p6 = scmp.ge.s32.totalorder %s1170_s17, 1  ;;  %p113_p7 = scmp.eq.s32.totalorder %s110_s23, 0 }
   0xb   : > { %p1243_p8 = por %p132_p5, %p131_p3  ;;  %p180_p9 = scmp.lt.s32.totalorder %s1170_s17, 9 }
   0xc   : > { %s1249_s25 = scalar_select %p113_p7, %s1158_s14, %s115_s21  }
   0xd   : > { %p181_p10 = pnand %p935_p6, %p180_p9 }
   0xe   : > { %s1252_s26 = sshll.u32 (!%p181_p10), %s1162_s15, 4  ;;  %s212_s5 = sand.u32 (!%p181_p10), 1, %s1154_s13  }
   0xf   : > { %184 = sbr.rel (%p181_p10) target bundleno = 498 (0x1f2), region = 32  ;;  %p220_p11 = scmp.lt.s32.totalorder (!%p181_p10), %s1252_s26, 124 }
  0x10   : > { %s936_s8 = sshll.u32 (!%p181_p10), %s212_s5, 7  ;;  %s1850_s10 = scalar_lea.sflag (!%p181_p10), [#allocation3], %s212_s5 }
  0x11   : > { %s1815_s9 = scalar_lea.vmem (!%p181_p10), [#allocation2], %s936_s8 }
  0x14   : > { %s221_s27 = scalar_select %p220_p11, %s1252_s26, 124  ;;  %vm257_vm0 = vcmask 523264   ;;  %v1172_v32 = vmov 64.0  }
  0x15   : > { %1047 = vrcp.f32 %v1172_v32  ;;  %s815_s11 = ssub.s32 (%p1236_p4), 125, %s1252_s26 }
  0x16   : > { %s938_s28 = sshll.u32 %s221_s27, 3  ;;  %p816_p12 = scmp.lt.s32.totalorder (%p1236_p4), %s815_s11, 16 }
  0x17   : > { %s1259_s4 = scalar_lea.vmem %s1916_s0, %s938_s28 }
  0x18   : > { %v1262_v0 = vld [vmem:[%s1259_s4 + $0x48] sm:$0xff]  ;;  %v249_v1 = vld [vmem:[%s1259_s4 + $0x40] sm:$0xff]  ;;  %v1286_v12 = vld [vmem:[%s1259_s4 + $0x50] sm:$0xff] }
  0x19   : > { %v241_v2 = vld [vmem:[%s1259_s4] sm:$0xff]  ;;  %v285_v3 = vsel %vm257_vm0, %v1262_v0, 0.0  ;;  %v282_v4 = vsel %vm257_vm0, %v249_v1, 0.0  ;;  %v1271_v6 = vld [vmem:[%s1259_s4 + $0x68] sm:$0xff]  ;;  %v288_v15 = vsel %vm257_vm0, %v1286_v12, 0.0  ;;  %v1301_v18 = vld [vmem:[%s1259_s4 + $0x30] sm:$0xff] }
  0x1a   : > { %v258_v5 = vsel %vm257_vm0, %v241_v2, 0.0  ;;  %286 = vadd.xlane.f32.xlu2 %v285_v3  ;;  %283 = vadd.xlane.f32.xlu0 %v282_v4  ;;  %v1274_v7 = vld [vmem:[%s1259_s4 + $0x60] sm:$0xff]  ;;  %v297_v9 = vsel %vm257_vm0, %v1271_v6, 0.0  ;;  %v1289_v13 = vld [vmem:[%s1259_s4 + $0x8] sm:$0xff]  ;;  %v1304_v19 = vld [vmem:[%s1259_s4 + $0x70] sm:$0xff]  ;;  %v276_v21 = vsel %vm257_vm0, %v1301_v18, 0.0 }
  0x1b   : > { %259 = vadd.xlane.f32.xlu1 %v258_v5  ;;  %v1277_v8 = vld [vmem:[%s1259_s4 + $0x20] sm:$0xff]  ;;  %v294_v10 = vsel %vm257_vm0, %v1274_v7, 0.0  ;;  %v1292_v14 = vld [vmem:[%s1259_s4 + $0x28] sm:$0xff]  ;;  %v261_v16 = vsel %vm257_vm0, %v1289_v13, 0.0  ;;  %v1307_v20 = vld [vmem:[%s1259_s4 + $0x10] sm:$0xff]  ;;  %v300_v22 = vsel %vm257_vm0, %v1304_v19, 0.0  ;;  %v1048_v33 = vpop.eup %1047 }
  0x1c   : > { %v270_v11 = vsel %vm257_vm0, %v1277_v8, 0.0  ;;  %v273_v17 = vsel %vm257_vm0, %v1292_v14, 0.0  ;;  %v264_v23 = vsel %vm257_vm0, %v1307_v20, 0.0  ;;  %v1316_v24 = vld [vmem:[%s1259_s4 + $0x18] sm:$0xff]  ;;  %v307_v34 = vmul.f32 64.0, %v1048_v33 }
  0x1d   : > { %v1319_v25 = vld [vmem:[%s1259_s4 + $0x58] sm:$0xff]  ;;  %v267_v27 = vsel %vm257_vm0, %v1316_v24, 0.0  ;;  %vm311_vm1 = vweird.f32 %v1048_v33 }
  0x1e   : > { %v1322_v26 = vld [vmem:[%s1259_s4 + $0x78] sm:$0xff]  ;;  %v291_v28 = vsel %vm257_vm0, %v1319_v25, 0.0  ;;  %v308_v35 = vsub.f32 1.0, %v307_v34 }
  0x1f   : > { %v303_v29 = vsel %vm257_vm0, %v1322_v26, 0.0  ;;  %v1331_v30 = vld [vmem:[%s1259_s4 + $0x38] sm:$0xff] }
  0x20   : > { %v279_v31 = vsel %vm257_vm0, %v1331_v30, 0.0  ;;  %v309_v36 = vmul.f32 %v1048_v33, %v308_v35 }
  0x22   : > { %298 = vadd.xlane.f32.xlu2 %v297_v9  ;;  %295 = vadd.xlane.f32.xlu0 %v294_v10  ;;  %v310_v37 = vadd.f32 %v1048_v33, %v309_v36 }
  0x23   : > { %271 = vadd.xlane.f32.xlu1 %v270_v11 }
  0x24   : > { %v1335_v38 = vsel %vm311_vm1, %v1048_v33, %v310_v37 }
  0x2a   : > { %289 = vadd.xlane.f32.xlu2 %v288_v15  ;;  %262 = vadd.xlane.f32.xlu0 %v261_v16 }
  0x2b   : > { %274 = vadd.xlane.f32.xlu1 %v273_v17 }
  0x32   : > { %277 = vadd.xlane.f32.xlu2 %v276_v21  ;;  %301 = vadd.xlane.f32.xlu0 %v300_v22 }
  0x33   : > { %265 = vadd.xlane.f32.xlu1 %v264_v23 }
  0x3a   : > { %268 = vadd.xlane.f32.xlu2 %v267_v27  ;;  %292 = vadd.xlane.f32.xlu0 %v291_v28 }
  0x3b   : > { %304 = vadd.xlane.f32.xlu1 %v303_v29 }
  0x42   : > { %280 = vadd.xlane.f32.xlu0 %v279_v31 }
  0x8d   : > { %v287_v39 = vpop.xlane.xlu2 %286  ;;  %v284_v40 = vpop.xlane.xlu0 %283 }
  0x8e   : > { %v321_v41 = vmul.f32 %v1335_v38, %v284_v40  ;;  %v260_v42 = vpop.xlane.xlu1 %259  ;;  %v322_v56 = vmul.f32 %v1335_v38, %v287_v39 }
  0x8f   : > { %v313_v43 = vmul.f32 %v1335_v38, %v260_v42 }
  0x90   : > { %v1339_v44 = vsub.f32 %v249_v1, %v321_v41  ;;  %v1369_v63 = vsub.f32 %v1262_v0, %v322_v56 }
  0x91   : > { %v1341_v45 = vsub.f32 %v241_v2, %v313_v43 }
  0x92   : > { %v353_v46 = vmul.f32 %v1339_v44, %v1339_v44  ;;  %v354_v11 = vmul.f32 %v1369_v63, %v1369_v63 }
  0x93   : > { %v345_v47 = vmul.f32 %v1341_v45, %v1341_v45 }
  0x94   : > { %v385_v48 = vsel %vm257_vm0, %v353_v46, 0.0  ;;  %v388_v21 = vsel %vm257_vm0, %v354_v11, 0.0 }
  0x95   : > { %v299_v49 = vpop.xlane.xlu2 %298  ;;  %v296_v50 = vpop.xlane.xlu0 %295  ;;  %386 = vadd.xlane.f32.xlu1 %v385_v48  ;;  %v361_v51 = vsel %vm257_vm0, %v345_v47, 0.0 }
  0x96   : > { %v326_v52 = vmul.f32 %v1335_v38, %v299_v49  ;;  %v325_v53 = vmul.f32 %v1335_v38, %v296_v50  ;;  %362 = vadd.xlane.f32.xlu0 %v361_v51  ;;  %v272_v54 = vpop.xlane.xlu1 %271 }
  0x97   : > { %v317_v55 = vmul.f32 %v1335_v38, %v272_v54 }
  0x98   : > { %v1354_v57 = vsub.f32 %v1271_v6, %v326_v52  ;;  %v1357_v58 = vsub.f32 %v1274_v7, %v325_v53 }
  0x99   : > { %v1360_v59 = vsub.f32 %v1277_v8, %v317_v55 }
  0x9a   : > { %v357_v60 = vmul.f32 %v1357_v58, %v1357_v58  ;;  %v358_v61 = vmul.f32 %v1354_v57, %v1354_v57 }
  0x9b   : > { %v349_v62 = vmul.f32 %v1360_v59, %v1360_v59 }
  0x9c   : > { %v397_v1 = vsel %vm257_vm0, %v357_v60, 0.0  ;;  %v400_v2 = vsel %vm257_vm0, %v358_v61, 0.0 }
  0x9d   : > { %v290_v3 = vpop.xlane.xlu2 %289  ;;  %398 = vadd.xlane.f32.xlu2 %v397_v1  ;;  %v263_v4 = vpop.xlane.xlu0 %262  ;;  %v373_v5 = vsel %vm257_vm0, %v349_v62, 0.0  ;;  %v624_v62 = vld [vmem:[%s1917_s1 + $0x38] sm:$0xff]  ;;  %v622_v1 = vld [vmem:[%s1917_s1 + $0x28] sm:$0xff] }
  0x9e   : > { %v323_v6 = vmul.f32 %v1335_v38, %v290_v3  ;;  %v314_v7 = vmul.f32 %v1335_v38, %v263_v4  ;;  %401 = vadd.xlane.f32.xlu0 %v400_v2  ;;  %374 = vadd.xlane.f32.xlu1 %v373_v5  ;;  %v275_v8 = vpop.xlane.xlu1 %274  ;;  %v621_v2 = vld [vmem:[%s1917_s1 + $0x20] sm:$0xff]  ;;  %v620_v3 = vld [vmem:[%s1917_s1 + $0x18] sm:$0xff]  ;;  %v619_v4 = vld [vmem:[%s1917_s1 + $0x10] sm:$0xff] }
  0x9f   : > { %v318_v9 = vmul.f32 %v1335_v38, %v275_v8  ;;  %685 = vmatpush.msra.mxu0 %v624_v62  ;;  %966 = vmatpush.msra.mxu2 %v624_v62  ;;  %v618_v5 = vld [vmem:[%s1917_s1 + $0x8] sm:$0xff] }
  0xa0   : > { %v1378_v0 = vsub.f32 %v1286_v12, %v323_v6  ;;  %v1381_v10 = vsub.f32 %v1289_v13, %v314_v7  ;;  %965 = vmatpush.msra.mxu1 %v624_v62  ;;  %967 = vmatpush.msra.mxu3 %v624_v62  ;;  %v617_v6 = vld [vmem:[%s1917_s1] sm:$0xff] }
  0xa1   : > { %v1390_v17 = vsub.f32 %v1292_v14, %v318_v9 }
  0xa2   : > { %v355_v15 = vmul.f32 %v1378_v0, %v1378_v0  ;;  %v346_v16 = vmul.f32 %v1381_v10, %v1381_v10 }
  0xa3   : > { %v350_v29 = vmul.f32 %v1390_v17, %v1390_v17 }
  0xa4   : > { %v391_v12 = vsel %vm257_vm0, %v355_v15, 0.0  ;;  %v364_v22 = vsel %vm257_vm0, %v346_v16, 0.0 }
  0xa5   : > { %v278_v13 = vpop.xlane.xlu2 %277  ;;  %389 = vadd.xlane.f32.xlu2 %v388_v21  ;;  %v302_v23 = vpop.xlane.xlu0 %301  ;;  %v376_v36 = vsel %vm257_vm0, %v350_v29, 0.0 }
  0xa6   : > { %v319_v27 = vmul.f32 %v1335_v38, %v278_v13  ;;  %v327_v28 = vmul.f32 %v1335_v38, %v302_v23  ;;  %392 = vadd.xlane.f32.xlu0 %v391_v12  ;;  %365 = vadd.xlane.f32.xlu1 %v364_v22  ;;  %v266_v14 = vpop.xlane.xlu1 %265 }
  0xa7   : > { %v315_v31 = vmul.f32 %v1335_v38, %v266_v14 }
  0xa8   : > { %v1401_v32 = vsub.f32 %v1301_v18, %v319_v27  ;;  %v1404_v33 = vsub.f32 %v1304_v19, %v327_v28 }
  0xa9   : > { %v1412_v37 = vsub.f32 %v1307_v20, %v315_v31 }
  0xaa   : > { %v351_v34 = vmul.f32 %v1401_v32, %v1401_v32  ;;  %v359_v35 = vmul.f32 %v1404_v33, %v1404_v33 }
  0xab   : > { %v347_v43 = vmul.f32 %v1412_v37, %v1412_v37 }
  0xac   : > { %v379_v39 = vsel %vm257_vm0, %v351_v34, 0.0  ;;  %v403_v40 = vsel %vm257_vm0, %v359_v35, 0.0 }
  0xad   : > { %v269_v18 = vpop.xlane.xlu2 %268  ;;  %v293_v41 = vpop.xlane.xlu0 %292  ;;  %377 = vadd.xlane.f32.xlu2 %v376_v36  ;;  %v367_v51 = vsel %vm257_vm0, %v347_v43, 0.0 }
  0xae   : > { %v316_v19 = vmul.f32 %v1335_v38, %v269_v18  ;;  %v324_v42 = vmul.f32 %v1335_v38, %v293_v41  ;;  %380 = vadd.xlane.f32.xlu0 %v379_v39  ;;  %404 = vadd.xlane.f32.xlu1 %v403_v40  ;;  %v305_v46 = vpop.xlane.xlu1 %304 }
  0xaf   : > { %v328_v20 = vmul.f32 %v1335_v38, %v305_v46 }
  0xb0   : > { %v1422_v47 = vsub.f32 %v1316_v24, %v316_v19  ;;  %v1425_v48 = vsub.f32 %v1319_v25, %v324_v42 }
  0xb1   : > { %v1433_v52 = vsub.f32 %v1322_v26, %v328_v20 }
  0xb2   : > { %v348_v49 = vmul.f32 %v1422_v47, %v1422_v47  ;;  %v356_v50 = vmul.f32 %v1425_v48, %v1425_v48 }
  0xb3   : > { %v360_v55 = vmul.f32 %v1433_v52, %v1433_v52 }
  0xb4   : > { %v370_v53 = vsel %vm257_vm0, %v348_v49, 0.0  ;;  %v394_v54 = vsel %vm257_vm0, %v356_v50, 0.0 }
  0xb5   : > { %v281_v24 = vpop.xlane.xlu0 %280  ;;  %368 = vadd.xlane.f32.xlu2 %v367_v51  ;;  %v406_v60 = vsel %vm257_vm0, %v360_v55, 0.0 }
  0xb6   : > { %v320_v25 = vmul.f32 %v1335_v38, %v281_v24  ;;  %371 = vadd.xlane.f32.xlu0 %v370_v53  ;;  %395 = vadd.xlane.f32.xlu1 %v394_v54 }
  0xb8   : > { %v1441_v56 = vsub.f32 %v1331_v30, %v320_v25  ;;  %v623_v30 = vld [vmem:[%s1917_s1 + $0x30] sm:$0xff] }
  0xb9   : > { %686 = vmatpush.msra.mxu0 %v623_v30  ;;  %969 = vmatpush.msra.mxu2 %v623_v30 }
  0xba   : > { %v352_v26 = vmul.f32 %v1441_v56, %v1441_v56  ;;  %968 = vmatpush.msra.mxu1 %v623_v30  ;;  %970 = vmatpush.msra.mxu3 %v623_v30 }
  0xbb   : > { %687 = vmatpush.msra.mxu0 %v622_v1  ;;  %972 = vmatpush.msra.mxu2 %v622_v1 }
  0xbc   : > { %v382_v61 = vsel %vm257_vm0, %v352_v26, 0.0  ;;  %971 = vmatpush.msra.mxu1 %v622_v1  ;;  %973 = vmatpush.msra.mxu3 %v622_v1 }
  0xbd   : > { %407 = vadd.xlane.f32.xlu2 %v406_v60  ;;  %688 = vmatpush.msra.mxu0 %v621_v2 }
  0xbe   : > { %383 = vadd.xlane.f32.xlu1 %v382_v61  ;;  %975 = vmatpush.msra.mxu2 %v621_v2 }
  0xbf   : > { %974 = vmatpush.msra.mxu1 %v621_v2  ;;  %976 = vmatpush.msra.mxu3 %v621_v2 }
  0xc0   : > { %689 = vmatpush.msra.mxu0 %v620_v3  ;;  %978 = vmatpush.msra.mxu2 %v620_v3 }
  0xc1   : > { %977 = vmatpush.msra.mxu1 %v620_v3  ;;  %979 = vmatpush.msra.mxu3 %v620_v3 }
  0xc2   : > { %690 = vmatpush.msra.mxu0 %v619_v4  ;;  %981 = vmatpush.msra.mxu2 %v619_v4 }
  0xc3   : > { %980 = vmatpush.msra.mxu1 %v619_v4  ;;  %982 = vmatpush.msra.mxu3 %v619_v4 }
  0xc4   : > { %691 = vmatpush.msra.mxu0 %v618_v5  ;;  %984 = vmatpush.msra.mxu2 %v618_v5 }
  0xc5   : > { %983 = vmatpush.msra.mxu1 %v618_v5  ;;  %985 = vmatpush.msra.mxu3 %v618_v5 }
  0xc6   : > { %692 = vmatpush.msra.mxu0 %v617_v6  ;;  %987 = vmatpush.msra.mxu2 %v617_v6 }
  0xc7   : > { %986 = vmatpush.msra.mxu1 %v617_v6  ;;  %988 = vmatpush.msra.mxu3 %v617_v6 }
 0x108   : > { %v387_v7 = vpop.xlane.xlu1 %386 }
 0x109   : > { %v363_v8 = vpop.xlane.xlu0 %362  ;;  %v417_v9 = vmul.f32 %v387_v7, %v1335_v38 }
 0x10a   : > { %v409_v11 = vmul.f32 %v363_v8, %v1335_v38 }
 0x10b   : > { %v1473_v15 = vadd.f32 1e-05, %v417_v9 }
 0x10c   : > { %v425_v16 = vadd.f32 1e-05, %v409_v11 }
 0x10d   : > { %1049 = vrsqrt.f32 %v1473_v15  ;;  %vm527_vm5 = vweird.f32 %v1473_v15 }
 0x10e   : > { %1051 = vrsqrt.f32 %v425_v16  ;;  %vm447_vm2 = vweird.f32 %v425_v16 }
 0x110   : > { %v399_v21 = vpop.xlane.xlu2 %398 }
 0x111   : > { %v421_v12 = vmul.f32 %v399_v21, %v1335_v38  ;;  %v402_v22 = vpop.xlane.xlu0 %401  ;;  %v375_v13 = vpop.xlane.xlu1 %374 }
 0x112   : > { %v422_v23 = vmul.f32 %v402_v22, %v1335_v38  ;;  %v413_v27 = vmul.f32 %v375_v13, %v1335_v38 }
 0x113   : > { %v1479_v28 = vpop.eup %1049  ;;  %v1481_v29 = vadd.f32 1e-05, %v421_v12 }
 0x114   : > { %v1483_v14 = vpop.eup %1051  ;;  %v522_v31 = vmul.f32 %v1479_v28, %v1473_v15  ;;  %v1487_v34 = vadd.f32 1e-05, %v422_v23  ;;  %v1489_v35 = vadd.f32 1e-05, %v413_v27  ;;  %vm528_vm4 = vweird.f32 %v1479_v28 }
 0x115   : > { %v442_v36 = vmul.f32 %v1483_v14, %v425_v16  ;;  %1053 = vrsqrt.f32 %v1481_v29  ;;  %vm448_vm3 = vweird.f32 %v1483_v14  ;;  %vm1541_vm7 = vmor %vm527_vm5, %vm528_vm4  ;;  %vm567_vm8 = vweird.f32 %v1481_v29 }
 0x116   : > { %v523_v39 = vmul.f32 %v1479_v28, %v522_v31  ;;  %1055 = vrsqrt.f32 %v1487_v34  ;;  %vm1533_vm6 = vmor %vm447_vm2, %vm448_vm3  ;;  %vm487_vm9 = vweird.f32 %v1489_v35  ;;  %vm577_vm15 = vweird.f32 %v1487_v34 }
 0x117   : > { %v443_v40 = vmul.f32 %v1483_v14, %v442_v36  ;;  %1057 = vrsqrt.f32 %v1489_v35 }
 0x118   : > { %v390_v18 = vpop.xlane.xlu2 %389  ;;  %v524_v19 = vmul.f32 0.5, %v523_v39 }
 0x119   : > { %v444_v41 = vmul.f32 0.5, %v443_v40  ;;  %v418_v42 = vmul.f32 %v390_v18, %v1335_v38  ;;  %v393_v43 = vpop.xlane.xlu0 %392  ;;  %v366_v46 = vpop.xlane.xlu1 %365 }
 0x11a   : > { %v419_v20 = vmul.f32 %v393_v43, %v1335_v38  ;;  %v410_v49 = vmul.f32 %v366_v46, %v1335_v38  ;;  %v525_v60 = vsub.f32 1.5, %v524_v19 }
 0x11b   : > { %v1500_v50 = vpop.eup %1053  ;;  %v1502_v51 = vadd.f32 1e-05, %v418_v42  ;;  %v445_v54 = vsub.f32 1.5, %v444_v41 }
 0x11c   : > { %v1504_v53 = vpop.eup %1055  ;;  %v562_v24 = vmul.f32 %v1500_v50, %v1481_v29  ;;  %v1508_v25 = vadd.f32 1e-05, %v419_v20  ;;  %v1510_v55 = vadd.f32 1e-05, %v410_v49  ;;  %v526_v7 = vmul.f32 %v1479_v28, %v525_v60 }
 0x11d   : > { %v1512_v26 = vpop.eup %1057  ;;  %1059 = vrsqrt.f32 %v1502_v51  ;;  %v572_v30 = vmul.f32 %v1504_v53, %v1487_v34  ;;  %v446_v3 = vmul.f32 %v1483_v14, %v445_v54  ;;  %vm568_vm10 = vweird.f32 %v1500_v50 }
 0x11e   : > { %v482_v61 = vmul.f32 %v1512_v26, %v1489_v35  ;;  %v563_v62 = vmul.f32 %v1500_v50, %v562_v24  ;;  %1061 = vrsqrt.f32 %v1510_v55  ;;  %v530_v40 = vsel %vm1541_vm7, %v1479_v28, %v526_v7  ;;  %vm1622_vm4 = vmor %vm567_vm8, %vm568_vm10 }
 0x11f   : > { %1063 = vrsqrt.f32 %v1508_v25  ;;  %v573_v22 = vmul.f32 %v1504_v53, %v572_v30  ;;  %v450_v36 = vsel %vm1533_vm6, %v1483_v14, %v446_v3  ;;  %vm488_vm11 = vweird.f32 %v1512_v26 }
 0x120   : > { %v483_v1 = vmul.f32 %v1512_v26, %v482_v61  ;;  %v378_v2 = vpop.xlane.xlu2 %377  ;;  %v564_v12 = vmul.f32 0.5, %v563_v62  ;;  %v601_v46 = vmul.f32 %v450_v36, %v1341_v45  ;;  %v609_v20 = vmul.f32 %v530_v40, %v1339_v44  ;;  %vm1592_vm13 = vmor %vm487_vm9, %vm488_vm11 }
 0x121   : > { %v381_v4 = vpop.xlane.xlu0 %380  ;;  %v414_v5 = vmul.f32 %v378_v2, %v1335_v38  ;;  %v405_v6 = vpop.xlane.xlu1 %404  ;;  %v1567_v42 = vmul.f32 0.5, %v573_v22  ;;  %vm457_vm12 = vweird.f32 %v1510_v55  ;;  %vm578_vm1 = vweird.f32 %v1504_v53 }
 0x122   : > { %v484_v8 = vmul.f32 0.5, %v483_v1  ;;  %v415_v9 = vmul.f32 %v381_v4, %v1335_v38  ;;  %v423_v23 = vmul.f32 %v405_v6, %v1335_v38  ;;  %v565_v19 = vsub.f32 1.5, %v564_v12  ;;  %939 = vmatmul.msk.f32.vlgmr.msra.gmra.mxu0 %vm257_vm0, %v601_v46  ;;  %947 = vmatmul.msk.f32.vlgmr.msra.gmra.mxu2 %vm257_vm0, %v609_v20 }
 0x123   : > { %v1530_v11 = vpop.eup %1059  ;;  %v1538_v13 = vadd.f32 1e-05, %v414_v5  ;;  %v575_v3 = vsub.f32 1.5, %v1567_v42  ;;  %vm537_vm2 = vweird.f32 %v1502_v51  ;;  %vm547_vm5 = vweird.f32 %v1508_v25 }
 0x124   : > { %v485_v15 = vsub.f32 1.5, %v484_v8  ;;  %v532_v31 = vmul.f32 %v1530_v11, %v1502_v51  ;;  %v1547_v16 = vadd.f32 1e-05, %v415_v9  ;;  %v1552_v39 = vpop.eup %1061  ;;  %v1569_v43 = vadd.f32 1e-05, %v423_v23 }
 0x125   : > { %1065 = vrsqrt.f32 %v1538_v13  ;;  %v1560_v18 = vpop.eup %1063  ;;  %v452_v14 = vmul.f32 %v1552_v39, %v1510_v55  ;;  %vm538_vm14 = vweird.f32 %v1530_v11  ;;  %v566_v6 = vmul.f32 %v1500_v50, %v565_v19 }
 0x126   : > { %v533_v41 = vmul.f32 %v1530_v11, %v532_v31  ;;  %1067 = vrsqrt.f32 %v1547_v16  ;;  %v486_v54 = vmul.f32 %v1512_v26, %v485_v15  ;;  %v542_v24 = vmul.f32 %v1560_v18, %v1508_v25 }
 0x127   : > { %v453_v28 = vmul.f32 %v1552_v39, %v452_v14  ;;  %1069 = vrsqrt.f32 %v1569_v43  ;;  %vm458_vm3 = vweird.f32 %v1552_v39  ;;  %vm548_vm6 = vweird.f32 %v1560_v18 }
 0x128   : > { %v369_v49 = vpop.xlane.xlu2 %368  ;;  %v534_v62 = vmul.f32 0.5, %v533_v41  ;;  %v490_v21 = vsel %vm1592_vm13, %v1512_v26, %v486_v54  ;;  %v543_v12 = vmul.f32 %v1560_v18, %v542_v24  ;;  %v570_v40 = vsel %vm1622_vm4, %v1500_v50, %v566_v6  ;;  %vm459_vm8 = vmor %vm457_vm12, %vm458_vm3 }
 0x129   : > { %v372_v45 = vpop.xlane.xlu0 %371  ;;  %v411_v60 = vmul.f32 %v369_v49, %v1335_v38  ;;  %v396_v61 = vpop.xlane.xlu1 %395  ;;  %v454_v30 = vmul.f32 0.5, %v453_v28  ;;  %v605_v29 = vmul.f32 %v490_v21, %v1360_v59  ;;  %vm497_vm7 = vweird.f32 %v1538_v13  ;;  %vm539_vm12 = vmor %vm537_vm2, %vm538_vm14 }
 0x12a   : > { %v412_v44 = vmul.f32 %v372_v45, %v1335_v38  ;;  %v420_v1 = vmul.f32 %v396_v61, %v1335_v38  ;;  %v535_v26 = vsub.f32 1.5, %v534_v62  ;;  %v544_v28 = vmul.f32 0.5, %v543_v12  ;;  %vm1687_vm3 = vmor %vm577_vm15, %vm578_vm1 }
 0x12b   : > { %v1585_v2 = vpop.eup %1065  ;;  %v1597_v5 = vadd.f32 1e-05, %v411_v60  ;;  %v455_v8 = vsub.f32 1.5, %v454_v30  ;;  %vm507_vm9 = vweird.f32 %v1547_v16  ;;  %943 = vmatmul.msk.f32.vlgmr.msra.gmra.mxu1 %vm257_vm0, %v605_v29  ;;  %v613_v59 = vmul.f32 %v570_v40, %v1357_v58  ;;  %vm1711_vm1 = vmor %vm547_vm5, %vm548_vm6 }
 0x12c   : > { %v1601_v7 = vpop.eup %1067  ;;  %v492_v35 = vmul.f32 %v1585_v2, %v1538_v13  ;;  %v1607_v9 = vadd.f32 1e-05, %v412_v44  ;;  %v1628_v15 = vadd.f32 1e-05, %v420_v1  ;;  %vm587_vm10 = vweird.f32 %v1569_v43 }
 0x12d   : > { %v502_v22 = vmul.f32 %v1601_v7, %v1547_v16  ;;  %1071 = vrsqrt.f32 %v1597_v5  ;;  %v1630_v31 = vpop.eup %1069  ;;  %v456_v41 = vmul.f32 %v1552_v39, %v455_v8  ;;  %951 = vmatmul.msk.f32.vlgmr.msra.gmra.mxu3 %vm257_vm0, %v613_v59  ;;  %v536_v61 = vmul.f32 %v1530_v11, %v535_v26 }
 0x12e   : > { %v493_v27 = vmul.f32 %v1585_v2, %v492_v35  ;;  %1073 = vrsqrt.f32 %v1607_v9  ;;  %v582_v19 = vmul.f32 %v1630_v31, %v1569_v43  ;;  %vm498_vm11 = vweird.f32 %v1585_v2 }
 0x12f   : > { %v503_v36 = vmul.f32 %v1601_v7, %v502_v22  ;;  %1075 = vrsqrt.f32 %v1628_v15  ;;  %v460_v24 = vsel %vm459_vm8, %v1552_v39, %v456_v41  ;;  %v545_v39 = vsub.f32 1.5, %v544_v28  ;;  %vm499_vm14 = vmor %vm497_vm7, %vm498_vm11 }
 0x130   : > { %v494_v14 = vmul.f32 0.5, %v493_v27  ;;  %v408_v46 = vpop.xlane.xlu2 %407  ;;  %v583_v49 = vmul.f32 %v1630_v31, %v582_v19  ;;  %v602_v58 = vmul.f32 %v460_v24, %v1381_v10  ;;  %vm508_vm13 = vweird.f32 %v1601_v7 }
 0x131   : > { %v424_v50 = vmul.f32 %v408_v46, %v1335_v38  ;;  %v384_v20 = vpop.xlane.xlu1 %383  ;;  %v504_v55 = vmul.f32 0.5, %v503_v36  ;;  %v540_v22 = vsel %vm539_vm12, %v1530_v11, %v536_v61  ;;  %v576_v27 = vmul.f32 %v1504_v53, %v575_v3  ;;  %vm1728_vm4 = vmor %vm507_vm9, %vm508_vm13 }
 0x132   : > { %v416_v54 = vmul.f32 %v384_v20, %v1335_v38  ;;  %v495_v30 = vsub.f32 1.5, %v494_v14  ;;  %v584_v44 = vmul.f32 0.5, %v583_v49  ;;  %940 = vmatmul.msk.f32.gmra.mxu0 %vm257_vm0, %v602_v58  ;;  %v610_v26 = vmul.f32 %v540_v22, %v1369_v63 }
 0x133   : > { %v1656_v45 = vpop.eup %1071  ;;  %v1659_v60 = vadd.f32 1e-05, %v424_v50  ;;  %v505_v21 = vsub.f32 1.5, %v504_v55  ;;  %vm588_vm15 = vweird.f32 %v1630_v31  ;;  %v546_v11 = vmul.f32 %v1560_v18, %v545_v39 }
 0x134   : > { %v1663_v62 = vpop.eup %1073  ;;  %v462_v38 = vmul.f32 %v1656_v45, %v1597_v5  ;;  %v1667_v1 = vadd.f32 1e-05, %v416_v54  ;;  %v585_v6 = vsub.f32 1.5, %v584_v44  ;;  %v496_v34 = vmul.f32 %v1585_v2, %v495_v30  ;;  %948 = vmatmul.msk.f32.gmra.mxu2 %vm257_vm0, %v610_v26  ;;  %vm1740_vm7 = vmor %vm587_vm10, %vm588_vm15 }
 0x135   : > { %v472_v4 = vmul.f32 %v1663_v62, %v1607_v9  ;;  %1077 = vrsqrt.f32 %v1659_v60  ;;  %v1674_v10 = vpop.eup %1075  ;;  %v580_v13 = vsel %vm1687_vm3, %v1504_v53, %v576_v27  ;;  %vm467_vm2 = vweird.f32 %v1597_v5 }
 0x136   : > { %v463_v8 = vmul.f32 %v1656_v45, %v462_v38  ;;  %1079 = vrsqrt.f32 %v1667_v1  ;;  %v552_v51 = vmul.f32 %v1674_v10, %v1628_v15  ;;  %v500_v3 = vsel %vm499_vm14, %v1585_v2, %v496_v34 }
 0x137   : > { %v473_v12 = vmul.f32 %v1663_v62, %v472_v4  ;;  %v586_v40 = vmul.f32 %v1630_v31, %v585_v6  ;;  %v614_v25 = vmul.f32 %v580_v13, %v1354_v57  ;;  %v606_v19 = vmul.f32 %v500_v3, %v1390_v17 }
 0x138   : > { %v464_v23 = vmul.f32 0.5, %v463_v8  ;;  %v553_v29 = vmul.f32 %v1674_v10, %v552_v51  ;;  %vm477_vm5 = vweird.f32 %v1607_v9  ;;  %vm468_vm6 = vweird.f32 %v1656_v45 }
 0x139   : > { %v474_v36 = vmul.f32 0.5, %v473_v12  ;;  %v506_v2 = vmul.f32 %v1601_v7, %v505_v21  ;;  %vm557_vm8 = vweird.f32 %v1628_v15  ;;  %952 = vmatmul.msk.f32.gmra.mxu3 %vm257_vm0, %v614_v25  ;;  %944 = vmatmul.msk.f32.gmra.mxu1 %vm257_vm0, %v606_v19  ;;  %v550_v59 = vsel %vm1711_vm1, %v1560_v18, %v546_v11  ;;  %vm469_vm10 = vmor %vm467_vm2, %vm468_vm6 }
 0x13a   : > { %v465_v42 = vsub.f32 1.5, %v464_v23  ;;  %v554_v14 = vmul.f32 0.5, %v553_v29  ;;  %v590_v43 = vsel %vm1740_vm7, %v1630_v31, %v586_v40  ;;  %vm478_vm9 = vweird.f32 %v1663_v62 }
 0x13b   : > { %v1078_v41 = vpop.eup %1077  ;;  %v475_v50 = vsub.f32 1.5, %v474_v36  ;;  %vm558_vm11 = vweird.f32 %v1674_v10  ;;  %v611_v55 = vmul.f32 %v550_v59, %v1378_v0  ;;  %v510_v31 = vsel %vm1728_vm4, %v1601_v7, %v506_v2  ;;  %vm1782_vm14 = vmor %vm477_vm5, %vm478_vm9 }
 0x13c   : > { %v1080_v46 = vpop.eup %1079  ;;  %v592_v53 = vmul.f32 %v1078_v41, %v1659_v60  ;;  %v555_v17 = vsub.f32 1.5, %v554_v14  ;;  %v466_v49 = vmul.f32 %v1656_v45, %v465_v42  ;;  %v615_v30 = vmul.f32 %v590_v43, %v1404_v33  ;;  %vm1771_vm12 = vmor %vm557_vm8, %vm558_vm11 }
 0x13d   : > { %v512_v16 = vmul.f32 %v1080_v46, %v1667_v1  ;;  %vm598_vm13 = vweird.f32 %v1078_v41  ;;  %vm517_vm3 = vweird.f32 %v1667_v1  ;;  %949 = vmatmul.msk.f32.gmra.mxu2 %vm257_vm0, %v611_v55  ;;  %v476_v0 = vmul.f32 %v1663_v62, %v475_v50 }
 0x13e   : > { %v593_v20 = vmul.f32 %v1078_v41, %v592_v53  ;;  %v556_v18 = vmul.f32 %v1674_v10, %v555_v17  ;;  %v470_v58 = vsel %vm469_vm10, %v1656_v45, %v466_v49  ;;  %vm518_vm15 = vweird.f32 %v1080_v46 }
 0x13f   : > { %v513_v54 = vmul.f32 %v1080_v46, %v512_v16  ;;  %v603_v5 = vmul.f32 %v470_v58, %v1412_v37  ;;  %v607_v7 = vmul.f32 %v510_v31, %v1401_v32  ;;  %vm597_vm1 = vweird.f32 %v1659_v60  ;;  %vm519_vm4 = vmor %vm517_vm3, %vm518_vm15 }
 0x140   : > { %v594_v24 = vmul.f32 0.5, %v593_v20  ;;  %v560_v15 = vsel %vm1771_vm12, %v1674_v10, %v556_v18  ;;  %vm599_vm2 = vmor %vm597_vm1, %vm598_vm13  ;;  %v480_v32 = vsel %vm1782_vm14, %v1663_v62, %v476_v0 }
 0x141   : > { %v514_v61 = vmul.f32 0.5, %v513_v54  ;;  %941 = vmatmul.msk.f32.gmra.mxu0 %vm257_vm0, %v603_v5  ;;  %953 = vmatmul.msk.f32.gmra.mxu3 %vm257_vm0, %v615_v30  ;;  %v612_v39 = vmul.f32 %v560_v15, %v1425_v48  ;;  %v604_v60 = vmul.f32 %v480_v32, %v1422_v47  ;;  %v1810_v48 = vld [vmem:[%s1918_s2] ss:$0 sm:$0xff] }
 0x142   : > { %v595_v38 = vsub.f32 1.5, %v594_v24  ;;  %945 = vmatmul.msk.f32.gmra.mxu1 %vm257_vm0, %v607_v7 }
 0x143   : > { %v515_v37 = vsub.f32 1.5, %v514_v61 }
 0x144   : > { %v596_v45 = vmul.f32 %v1078_v41, %v595_v38 }
 0x145   : > { %v516_v9 = vmul.f32 %v1080_v46, %v515_v37  ;;  %950 = vmatmul.msk.f32.gmra.mxu2 %vm257_vm0, %v612_v39 }
 0x146   : > { %v600_v4 = vsel %vm599_vm2, %v1078_v41, %v596_v45 }
 0x147   : > { %v520_v10 = vsel %vm519_vm4, %v1080_v46, %v516_v9  ;;  %v616_v8 = vmul.f32 %v600_v4, %v1433_v52 }
 0x148   : > { %v608_v6 = vmul.f32 %v520_v10, %v1441_v56 }
 0x149   : > { %942 = vmatmul.msk.f32.gmra.mxu0 %vm257_vm0, %v604_v60  ;;  %954 = vmatmul.msk.f32.gmra.mxu3 %vm257_vm0, %v616_v8 }
 0x14a   : > { %946 = vmatmul.msk.f32.gmra.mxu1 %vm257_vm0, %v608_v6 }
 0x19f   : > { %v694_v47 = vpop.f32.mrf.mxu0 }
 0x1a0   : > { %v695_v56 = vadd.f32 %v1810_v48, %v694_v47 }
 0x1a2   : > { %vm742_vm5 = vcmp.gt.f32.partialorder %v695_v56, 0.0  ;;  %v758_v52 = vmul.f32 0.01, %v695_v56 }
 0x1a4   : > { %v774_v62 = vsel %vm742_vm5, %v695_v56, %v758_v52 }
 0x1a5   : > { %790 = vst [vmem:[%s1815_s9] sm:$0xff] %v774_v62  ;;  %v718_v1 = vpop.f32.mrf.mxu2 }
 0x1a6   : > { %v719_v35 = vadd.f32 %v1810_v48, %v718_v1 }
 0x1a8   : > { %v706_v21 = vpop.f32.mrf.mxu1  ;;  %vm750_vm0 = vcmp.gt.f32.partialorder %v719_v35, 0.0  ;;  %v766_v51 = vmul.f32 0.01, %v719_v35 }
 0x1a9   : > { %v707_v12 = vadd.f32 %v1810_v48, %v706_v21 }
 0x1aa   : > { %v782_v23 = vsel %vm750_vm0, %v719_v35, %v766_v51 }
 0x1ab   : > { %vm746_vm6 = vcmp.gt.f32.partialorder %v707_v12, 0.0  ;;  %v762_v22 = vmul.f32 0.01, %v707_v12  ;;  %798 = vst [vmem:[%s1815_s9 + $0x40] sm:$0xff] %v782_v23 }
 0x1ad   : > { %v778_v27 = vsel %vm746_vm6, %v707_v12, %v762_v22 }
 0x1ae   : > { %794 = vst [vmem:[%s1815_s9 + $0x20] sm:$0xff] %v778_v27 }
 0x1af   : > { %v697_v26 = vpop.f32.mrf.mxu0 }
 0x1b0   : > { %v698_v34 = vadd.f32 %v1810_v48, %v697_v26  ;;  %v730_v29 = vpop.f32.mrf.mxu3 }
 0x1b1   : > { %v731_v11 = vadd.f32 %v1810_v48, %v730_v29 }
 0x1b2   : > { %vm743_vm7 = vcmp.gt.f32.partialorder %v698_v34, 0.0  ;;  %v759_v36 = vmul.f32 0.01, %v698_v34 }
 0x1b3   : > { %vm754_vm8 = vcmp.gt.f32.partialorder %v731_v11, 0.0  ;;  %v770_v42 = vmul.f32 0.01, %v731_v11 }
 0x1b4   : > { %v775_v63 = vsel %vm743_vm7, %v698_v34, %v759_v36 }
 0x1b5   : > { %791 = vst [vmem:[%s1815_s9 + $0x8] sm:$0xff] %v775_v63  ;;  %v786_v3 = vsel %vm754_vm8, %v731_v11, %v770_v42 }
 0x1b6   : > { %v709_v13 = vpop.f32.mrf.mxu1  ;;  %802 = vst [vmem:[%s1815_s9 + $0x60] sm:$0xff] %v786_v3 }
 0x1b7   : > { %v710_v40 = vadd.f32 %v1810_v48, %v709_v13  ;;  %v721_v41 = vpop.f32.mrf.mxu2 }
 0x1b8   : > { %v722_v25 = vadd.f32 %v1810_v48, %v721_v41 }
 0x1b9   : > { %vm747_vm9 = vcmp.gt.f32.partialorder %v710_v40, 0.0  ;;  %v763_v14 = vmul.f32 0.01, %v710_v40 }
 0x1ba   : > { %vm751_vm10 = vcmp.gt.f32.partialorder %v722_v25, 0.0  ;;  %v767_v46 = vmul.f32 0.01, %v722_v25 }
 0x1bb   : > { %v779_v19 = vsel %vm747_vm9, %v710_v40, %v763_v14 }
 0x1bc   : > { %v733_v28 = vpop.f32.mrf.mxu3  ;;  %795 = vst [vmem:[%s1815_s9 + $0x28] sm:$0xff] %v779_v19  ;;  %v783_v17 = vsel %vm751_vm10, %v722_v25, %v767_v46 }
 0x1bd   : > { %v734_v2 = vadd.f32 %v1810_v48, %v733_v28  ;;  %799 = vst [vmem:[%s1815_s9 + $0x48] sm:$0xff] %v783_v17 }
 0x1be   : > { %v700_v53 = vpop.f32.mrf.mxu0 }
 0x1bf   : > { %v701_v57 = vadd.f32 %v1810_v48, %v700_v53  ;;  %v712_v16 = vpop.f32.mrf.mxu1  ;;  %vm755_vm11 = vcmp.gt.f32.partialorder %v734_v2, 0.0  ;;  %v771_v59 = vmul.f32 0.01, %v734_v2 }
 0x1c0   : > { %v713_v50 = vadd.f32 %v1810_v48, %v712_v16  ;;  %v724_v49 = vpop.f32.mrf.mxu2 }
 0x1c1   : > { %vm744_vm12 = vcmp.gt.f32.partialorder %v701_v57, 0.0  ;;  %v760_v20 = vmul.f32 0.01, %v701_v57  ;;  %v787_v43 = vsel %vm755_vm11, %v734_v2, %v771_v59  ;;  %v725_v18 = vadd.f32 %v1810_v48, %v724_v49 }
 0x1c2   : > { %vm748_vm13 = vcmp.gt.f32.partialorder %v713_v50, 0.0  ;;  %v764_v54 = vmul.f32 0.01, %v713_v50  ;;  %803 = vst [vmem:[%s1815_s9 + $0x68] sm:$0xff] %v787_v43 }
 0x1c3   : > { %v776_v24 = vsel %vm744_vm12, %v701_v57, %v760_v20  ;;  %vm752_vm3 = vcmp.gt.f32.partialorder %v725_v18, 0.0  ;;  %v768_v58 = vmul.f32 0.01, %v725_v18 }
 0x1c4   : > { %792 = vst [vmem:[%s1815_s9 + $0x10] sm:$0xff] %v776_v24  ;;  %v780_v55 = vsel %vm748_vm13, %v713_v50, %v764_v54  ;;  %v736_v31 = vpop.f32.mrf.mxu3 }
 0x1c5   : > { %796 = vst [vmem:[%s1815_s9 + $0x30] sm:$0xff] %v780_v55  ;;  %v737_v30 = vadd.f32 %v1810_v48, %v736_v31  ;;  %v784_v44 = vsel %vm752_vm3, %v725_v18, %v768_v58 }
 0x1c6   : > { %v703_v61 = vpop.f32.mrf.mxu0  ;;  %800 = vst [vmem:[%s1815_s9 + $0x50] sm:$0xff] %v784_v44 }
 0x1c7   : > { %v704_v5 = vadd.f32 %v1810_v48, %v703_v61  ;;  %v715_v38 = vpop.f32.mrf.mxu1  ;;  %vm756_vm14 = vcmp.gt.f32.partialorder %v737_v30, 0.0  ;;  %v772_v0 = vmul.f32 0.01, %v737_v30 }
 0x1c8   : > { %v716_v33 = vadd.f32 %v1810_v48, %v715_v38  ;;  %v727_v15 = vpop.f32.mrf.mxu2 }
 0x1c9   : > { %vm745_vm15 = vcmp.gt.f32.partialorder %v704_v5, 0.0  ;;  %v761_v37 = vmul.f32 0.01, %v704_v5  ;;  %v788_v7 = vsel %vm756_vm14, %v737_v30, %v772_v0  ;;  %v728_v9 = vadd.f32 %v1810_v48, %v727_v15 }
 0x1ca   : > { %vm749_vm1 = vcmp.gt.f32.partialorder %v716_v33, 0.0  ;;  %v765_v45 = vmul.f32 0.01, %v716_v33  ;;  %804 = vst [vmem:[%s1815_s9 + $0x70] sm:$0xff] %v788_v7 }
 0x1cb   : > { %v777_v39 = vsel %vm745_vm15, %v704_v5, %v761_v37  ;;  %vm753_vm2 = vcmp.gt.f32.partialorder %v728_v9, 0.0  ;;  %v769_v4 = vmul.f32 0.01, %v728_v9 }
 0x1cc   : > { %793 = vst [vmem:[%s1815_s9 + $0x18] sm:$0xff] %v777_v39  ;;  %v781_v32 = vsel %vm749_vm1, %v716_v33, %v765_v45  ;;  %v739_v10 = vpop.f32.mrf.mxu3 }
 0x1cd   : > { %797 = vst [vmem:[%s1815_s9 + $0x38] sm:$0xff] %v781_v32  ;;  %v740_v60 = vadd.f32 %v1810_v48, %v739_v10  ;;  %v785_v6 = vsel %vm753_vm2, %v728_v9, %v769_v4 }
 0x1ce   : > { %801 = vst [vmem:[%s1815_s9 + $0x58] sm:$0xff] %v785_v6  ;;  %813 = sbr.rel (!%p1236_p4) target bundleno = 498 (0x1f2), region = 36 }
 0x1cf   : > { %vm757_vm4 = vcmp.gt.f32.partialorder %v740_v60, 0.0  ;;  %v773_v8 = vmul.f32 0.01, %v740_v60 }
 0x1d1   : > { %v789_v47 = vsel %vm757_vm4, %v740_v60, %v773_v8 }
 0x1d2   : > { %805 = vst [vmem:[%s1815_s9 + $0x78] sm:$0xff] %v789_v47 }
 0x1d3   : > { %s1951_s11 = smov (!%p816_p12, %s815_s11), 16 }
 0x1d4   : > { %s957_s18 = sshll.u32 %s1951_s11, 3 }
 0x1d5   : > { %s819_s19 = ssub.s32 128, %s957_s18 }
 0x1d6   : > { %s820_s21 = sshll.u32 %s819_s19, 4 }
 0x1d7   : > { %821 = vsyncadd %s1850_s10, %s820_s21  ;;  %p1859_p13 = scmp.ne.s32.totalorder %s957_s18, 0  ;;  %s964_s22 = sshll.u32 %s1162_s15, 7 }
 0x1d8   : > { %s825_s28 = scalar_lea.hbm %s1919_s3, %s964_s22  ;;  %s827_s29 = sshll.u32 %s1815_s9, 4  ;;  %s1868_s29 = int_to_ptr.vmem [resolvable:$true] %s827_s29 }
 0x1d9   : > { %s829_s30 = sshll.u32 %s825_s28, 4  ;;  %s961_s4 = sshll.u32 %s1951_s11, 7  ;;  %s1870_s30 = int_to_ptr.hbm [resolvable:$true] %s829_s30 }
 0x1da   : > { %s1081_s5 = sshra.s32 %s1868_s29, 4  ;;  %s1083_s6 = sshrl.u32 %s961_s4, 4  ;;  %s1082_s5 = int_to_ptr.vmem [resolvable:$true] %s1081_s5 }
 0x1db   : > { %s1088_s7 = scalar_lea.vmem %s1082_s5, %s1083_s6  ;;  %s1173_s15 = smov [#allocation2]  }
 0x1dc   : > { %p1089_p0 = scmp.ne.s32.totalorder %s1082_s5, %s1088_s7  ;;  %s1092_s8 = scalar_lea.vmem %s1173_s15, 256 }
 0x1dd   : > { %p1094_p3 = scmp.lt.s32.totalorder %s1092_s8, %s1088_s7 }
 0x1de   : > { %p1090_p1 = pnand %p1089_p0, %p1859_p13 }
 0x1e0   : > { %p1091_p2 = pneg %p1090_p1 }
 0x1e2   : > { %p1096_p4 = pnand %p1094_p3, %p1091_p2 }
 0x1e4   : > { %1099 = shalt.err (!%p1096_p4)
}
 0x1e5   : > { %s1100_s9 = sshra.s32 %s1870_s30, 4  ;;  %s1111_s22 = scalar_lea.hbm %s1919_s3, 1000  ;;  %s1101_s9 = int_to_ptr.hbm [resolvable:$true] %s1100_s9 }
 0x1e6   : > { %s1107_s18 = scalar_lea.hbm %s1101_s9, %s1083_s6  ;;  %p1112_p9 = scmp.lt.s32.totalorder %s1101_s9, %s1919_s3 }
 0x1e7   : > { %p1108_p5 = scmp.ne.s32.totalorder %s1101_s9, %s1107_s18  ;;  %p1113_p10 = scmp.lt.s32.totalorder %s1111_s22, %s1107_s18 }
 0x1e9   : > { %p1109_p6 = pnand %p1108_p5, %p1859_p13  ;;  %p1114_p11 = por %p1113_p10, %p1112_p9 }
 0x1eb   : > { %p1110_p7 = pneg %p1109_p6 }
 0x1ed   : > { %p1115_p12 = pnand %p1114_p11, %p1110_p7 }
 0x1ef   : > { %1118 = shalt.err (!%p1115_p12)
}
 0x1f0   : > { %s1174_s28 = smov 128   ;;  %s1175_s5 = smov 8  }
 0x1f1   : > { %835 = dma.vmem_to_hbm [thread:$0]  (%p1859_p13), %s1868_s29, %s961_s4, %s1870_s30, %s1850_s10, %s1174_s28, %s1174_s28, %s1175_s5  }
 0x1f2 PF: > { %p994_p0 = scmp.ge.s32.totalorder %s1170_s17, 2  ;;  %s844_s6 = sand.u32 1, %s1150_s12  }
 0x1f3   : > { %s845_s7 = scalar_lea.sflag [#allocation3], %s844_s6 }
 0x1f4   : > { %p991_p1 = pnand %p994_p0, %p1243_p8 }
 0x1f6   : > { %p992_p2 = pneg %p991_p1 }
 0x1f8   : > { %1145 = dma.done.wait (%p992_p2), %s845_s7, 2048  }
 0x1f9   : > { %1147 = vsyncadd (%p992_p2), %s845_s7, 4294965248  ;;  %s16_s17 = sadd.s32 1, %s1170_s17   ;;  %s1943_s12 = smov %s1154_s13 }
 0x1fa   : > { %p13_p3 = scmp.ge.s32.totalorder %s16_s17, 10   ;;  %s1944_s13 = smov %s1158_s14 }
 0x1fb   : > { %s1945_s14 = smov %s1249_s25  ;;  %s1946_s15 = smov %s1166_s16 }
 0x1fc   : > { %s1947_s16 = smov %s1949_s20  ;;  %15 = sbr.rel (!%p13_p3) target bundleno = 4 (0x4), region = 73 }
 0x201   :  { %851 = vsyncpa [#allocation3], 1 }
 0x202   :  { %853 = vsyncpa [#allocation3 + $0x1], 1 }

</bundles_post_ra>
